<compile_context>
chip_gen: v7x
topology: tpu7x:2x2x1
jax: 0.10.0
libtpu: 0.0.40
codegen_flags: <defaults>
</compile_context>

<pallas_src>
import math
import functools

import jax
import jax.numpy as jnp
from jax import lax
from jax.experimental import pallas as pl
from jax.experimental.pallas import tpu as pltpu

# ----------------------------- config -----------------------------
VOCAB = 50
PAD_IDX = 1
EMBED_DIM = 32
NUM_HEADS = 4
HEAD_DIM = EMBED_DIM // NUM_HEADS
FFN_DIM = 64
NUM_LAYERS = 2
MAX_SRC_POS = 64
LN_EPS = 1e-5

WEIGHT_NAMES = ["wqkv", "bqkv", "wo", "bo", "ln1_g", "ln1_b",
                "w1", "b1", "w2", "b2", "ln2_g", "ln2_b"]


# ----------------------------- fused encoder kernel -----------------------------
def encoder_kernel(x0_ref, bias_ref,
                   wqkv_ref, bqkv_ref, wo_ref, bo_ref,
                   ln1g_ref, ln1b_ref,
                   w1_ref, b1_ref, w2_ref, b2_ref,
                   ln2g_ref, ln2b_ref,
                   x_out_ref, ctx_ref,
                   *, num_layers, num_heads, head_dim, batch, seq_len, eps):
    B, T, H, D = batch, seq_len, num_heads, head_dim
    C = H * D

    x = x0_ref[...]                                    # (B*T, C) f32, embed+pos already added

    # NOTE: the Python layer loop stays unrolled at L=2; for deeper stacks move layers
    # onto an 'arbitrary' grid axis with a layer-indexed weight index_map instead.
    for l in range(num_layers):
        # ---- fused QKV projection: one (B*T, C) @ (C, 3C) MXU matmul.
        #      Columns: [Q (scaled) | K | V], each in concat-of-heads (h*D+d) order.
        qkv = jnp.dot(x, wqkv_ref[l],
                      preferred_element_type=jnp.float32) + bqkv_ref[l]      # (B*T, 3C)

        # ---- per (batch, head) scaled-dot-product attention on tiny 2-D tiles.
        #      Contexts go into a lane-dense VMEM scratch in concat-of-heads layout so the
        #      output projection below is a single K=C contraction.
        for b in range(B):
            r0 = b * T
            bias_b = bias_ref[b]                                             # (1, T) additive
            for h in range(H):
                c0 = h * D
                qh = qkv[r0:r0 + T, c0:c0 + D]                               # (T, D)
                kh = qkv[r0:r0 + T, C + c0:C + c0 + D]                       # (T, D)
                vh = qkv[r0:r0 + T, 2 * C + c0:2 * C + c0 + D]               # (T, D)

                # key_padding_mask applied as additive -1e9 bias (a fully-padded row
                # degenerates to uniform attention instead of NaN -- documented).
                s = jnp.einsum("qd,kd->qk", qh, kh,
                               preferred_element_type=jnp.float32) + bias_b  # (T, T)
                s = s - jnp.max(s, axis=-1, keepdims=True)
                p = jnp.exp(s)
                p = p * pl.reciprocal(jnp.sum(p, axis=-1, keepdims=True), approx=True)
                ctx_ref[r0:r0 + T, c0:c0 + D] = jnp.dot(
                    p, vh, preferred_element_type=jnp.float32)               # (T, D)

        # ---- output projection: single (B*T, C) @ (C, C) contraction (concat-of-heads @ Wo)
        attn = jnp.dot(ctx_ref[...], wo_ref[l],
                       preferred_element_type=jnp.float32) + bo_ref[l]       # (B*T, C)

        # ---- residual + LayerNorm (post-norm) ----
        y = x + attn
        mean = jnp.mean(y, axis=-1, keepdims=True)
        cen = y - mean
        var = jnp.mean(cen * cen, axis=-1, keepdims=True)
        x = cen * lax.rsqrt(var + eps) * ln1g_ref[l] + ln1b_ref[l]

        # ---- feed-forward ----
        hdn = jnp.maximum(
            jnp.dot(x, w1_ref[l], preferred_element_type=jnp.float32) + b1_ref[l], 0.0)
        f = jnp.dot(hdn, w2_ref[l], preferred_element_type=jnp.float32) + b2_ref[l]

        y = x + f
        mean = jnp.mean(y, axis=-1, keepdims=True)
        cen = y - mean
        var = jnp.mean(cen * cen, axis=-1, keepdims=True)
        x = cen * lax.rsqrt(var + eps) * ln2g_ref[l] + ln2b_ref[l]

    # TODO(synk): a (B, T*C)=(2,256) lane-dense store would need an in-kernel (16,32)->(2,256)
    # relayout reshape; with the grid collapsed this single 2 KiB store is negligible, so the
    # output is kept as (B*T, C).
    x_out_ref[...] = x.astype(x_out_ref.dtype)


# ----------------------------- glue: embeddings / params -----------------------------
def sinusoidal_table(num_embeddings, dim, padding_idx):
    # fairseq SinusoidalPositionalEmbedding.get_embedding (even dim)
    half = dim // 2
    emb = math.log(10000) / (half - 1)
    freqs = jnp.exp(jnp.arange(half, dtype=jnp.float32) * -emb)
    ang = jnp.arange(num_embeddings, dtype=jnp.float32)[:, None] * freqs[None, :]
    table = jnp.concatenate([jnp.sin(ang), jnp.cos(ang)], axis=1)
    table = table.at[padding_idx].set(0.0)
    return table


def make_positions(tokens, padding_idx):
    # fairseq utils.make_positions
    mask = (tokens != padding_idx).astype(jnp.int32)
    return jnp.cumsum(mask, axis=1) * mask + padding_idx


def init_params(key):
    keys = jax.random.split(key, 1 + NUM_LAYERS)
    emb = jax.random.normal(keys[0], (VOCAB, EMBED_DIM), jnp.float32) * (EMBED_DIM ** -0.5)
    emb = emb.at[PAD_IDX].set(0.0)   # nn.Embedding padding_idx row is zero
    pos_table = sinusoidal_table(MAX_SRC_POS + PAD_IDX + 1, EMBED_DIM, PAD_IDX)

    scaling = HEAD_DIM ** -0.5       # folded into Q weights/bias (one-time host transform)

    def w(kk, shape, s=0.02):
        return jax.random.normal(kk, shape, jnp.float32) * s

    acc = {k: [] for k in WEIGHT_NAMES}
    for i in range(NUM_LAYERS):
        lk = jax.random.split(keys[1 + i], 12)
        wq, bq = w(lk[0], (EMBED_DIM, EMBED_DIM)), w(lk[1], (1, EMBED_DIM), 0.01)
        wk, bk = w(lk[2], (EMBED_DIM, EMBED_DIM)), w(lk[3], (1, EMBED_DIM), 0.01)
        wv, bv = w(lk[4], (EMBED_DIM, EMBED_DIM)), w(lk[5], (1, EMBED_DIM), 0.01)
        wo, bo = w(lk[6], (EMBED_DIM, EMBED_DIM)), w(lk[7], (1, EMBED_DIM), 0.01)
        w1, b1 = w(lk[8], (EMBED_DIM, FFN_DIM)), w(lk[9], (1, FFN_DIM), 0.01)
        w2, b2 = w(lk[10], (FFN_DIM, EMBED_DIM)), w(lk[11], (1, EMBED_DIM), 0.01)

        # Fused 2-D QKV weight (C, 3C): [Q*scale | K | V], columns in h*D+d (concat) order.
        acc["wqkv"].append(jnp.concatenate([wq * scaling, wk, wv], axis=1))
        acc["bqkv"].append(jnp.concatenate([bq * scaling, bk, bv], axis=1))
        acc["wo"].append(wo)                      # rows in h*D+d order (concat-of-heads @ Wo)
        acc["bo"].append(bo)
        acc["ln1_g"].append(jnp.ones((1, EMBED_DIM), jnp.float32))
        acc["ln1_b"].append(jnp.zeros((1, EMBED_DIM), jnp.float32))
        acc["w1"].append(w1)
        acc["b1"].append(b1)
        acc["w2"].append(w2)
        acc["b2"].append(b2)
        acc["ln2_g"].append(jnp.ones((1, EMBED_DIM), jnp.float32))
        acc["ln2_b"].append(jnp.zeros((1, EMBED_DIM), jnp.float32))

    params = dict(embed_tokens=emb, pos_table=pos_table)
    for k, v in acc.items():
        params[k] = jnp.stack(v, axis=0)          # leading layer axis (L, ...)
    return params


# ----------------------------- full forward -----------------------------
def transformer_encoder_forward(src_tokens, src_lengths, params):
    del src_lengths  # not used by the reference forward either
    B, T = src_tokens.shape
    C = EMBED_DIM
    embed_scale = math.sqrt(C)

    # Embedding gathers + embed/pos add stay as XLA glue (fuse into the gather kernel).
    tok_emb = params["embed_tokens"][src_tokens]                 # (B, T, C)
    encoder_embedding = embed_scale * tok_emb                    # returned as-is
    positions = make_positions(src_tokens, PAD_IDX)
    pos_emb = params["pos_table"][positions]                     # (B, T, C)
    x0 = (encoder_embedding + pos_emb).reshape(B * T, C)         # dropout = identity (eval)

    encoder_padding_mask = (src_tokens == PAD_IDX)               # (B, T) bool
    key_bias = jnp.where(encoder_padding_mask,
                         jnp.float32(-1e9), jnp.float32(0.0)).reshape(B, 1, T)

    kernel = functools.partial(
        encoder_kernel, num_layers=NUM_LAYERS, num_heads=NUM_HEADS,
        head_dim=HEAD_DIM, batch=B, seq_len=T, eps=LN_EPS)

    # Single invocation (no grid): everything (activations + ~70 KB of stacked weights)
    # is resident in VMEM; one launch instead of B grid steps.
    x_flat = pl.pallas_call(
        kernel,
        out_shape=jax.ShapeDtypeStruct((B * T, C), jnp.float32),
        scratch_shapes=[pltpu.VMEM((B * T, C), jnp.float32)],    # concat-of-heads context
    )(x0, key_bias, *[params[n] for n in WEIGHT_NAMES])

    x = x_flat.reshape(B, T, C).transpose(1, 0, 2)               # (T, B, C), fairseq convention
    encoder_states = None                                        # return_all_hiddens=False
    return x, encoder_padding_mask, encoder_embedding, encoder_states


# ----------------------------- main -----------------------------
if __name__ == "__main__":
    key = jax.random.PRNGKey(0)
    pkey, tkey = jax.random.split(key)
    params = init_params(pkey)

    B, T = 2, 8
    src_tokens = jax.random.randint(tkey, (B, T), 2, VOCAB, dtype=jnp.int32)
    src_tokens = src_tokens.at[1, 6:].set(PAD_IDX)               # pad tail of 2nd sequence
    src_lengths = jnp.sum(src_tokens != PAD_IDX, axis=1)

    fwd = jax.jit(transformer_encoder_forward)
    x, pad_mask, enc_emb, states = fwd(src_tokens, src_lengths, params)
    jax.block_until_ready((x, pad_mask, enc_emb))

    assert x.shape == (T, B, EMBED_DIM)
    assert pad_mask.shape == (B, T)
    assert enc_emb.shape == (B, T, EMBED_DIM)
    assert states is None
    assert bool(jnp.all(jnp.isfinite(x)))
    assert bool(jnp.all(jnp.isfinite(enc_emb)))
    print("KERNEL_OK")
</pallas_src>

<mosaic_0001>
module attributes {stable_mosaic.version = 11 : i64} {
  func.func @encoder_kernel(%arg0: memref<16x32xf32, #tpu.memory_space<vmem>>, %arg1: memref<2x1x8xf32, #tpu.memory_space<vmem>>, %arg2: memref<2x32x96xf32, #tpu.memory_space<vmem>>, %arg3: memref<2x1x96xf32, #tpu.memory_space<vmem>>, %arg4: memref<2x32x32xf32, #tpu.memory_space<vmem>>, %arg5: memref<2x1x32xf32, #tpu.memory_space<vmem>>, %arg6: memref<2x1x32xf32, #tpu.memory_space<vmem>>, %arg7: memref<2x1x32xf32, #tpu.memory_space<vmem>>, %arg8: memref<2x32x64xf32, #tpu.memory_space<vmem>>, %arg9: memref<2x1x64xf32, #tpu.memory_space<vmem>>, %arg10: memref<2x64x32xf32, #tpu.memory_space<vmem>>, %arg11: memref<2x1x32xf32, #tpu.memory_space<vmem>>, %arg12: memref<2x1x32xf32, #tpu.memory_space<vmem>>, %arg13: memref<2x1x32xf32, #tpu.memory_space<vmem>>, %arg14: memref<16x32xf32, #tpu.memory_space<vmem>>, %arg15: memref<16x32xf32, #tpu.memory_space<vmem>>) attributes {dimension_semantics = [], scalar_prefetch = 0 : i64, scratch_operands = 1 : i64, tpu.core_type = #tpu.core_type<tc>} {
    %c0 = arith.constant 0 : index
    %c0_0 = arith.constant 0 : index
    %0 = vector.load %arg0[%c0, %c0_0] : memref<16x32xf32, #tpu.memory_space<vmem>>, vector<16x32xf32>
    %c0_1 = arith.constant 0 : index
    %c0_2 = arith.constant 0 : index
    %c0_3 = arith.constant 0 : index
    %1 = vector.load %arg2[%c0_1, %c0_2, %c0_3] : memref<2x32x96xf32, #tpu.memory_space<vmem>>, vector<1x32x96xf32>
    %2 = vector.shape_cast %1 : vector<1x32x96xf32> to vector<32x96xf32>
    %cst = arith.constant dense<0.000000e+00> : vector<16x96xf32>
    %3 = tpu.matmul %0, %2, %cst {dimension_numbers = #tpu.dot_dimension_numbers<[1], [0], [0], [1], [0, 0, 1, 1], [], []>} : vector<16x32xf32>, vector<32x96xf32>, vector<16x96xf32> -> vector<16x96xf32>
    %c0_4 = arith.constant 0 : index
    %c0_5 = arith.constant 0 : index
    %c0_6 = arith.constant 0 : index
    %4 = vector.load %arg3[%c0_4, %c0_5, %c0_6] : memref<2x1x96xf32, #tpu.memory_space<vmem>>, vector<1x1x96xf32>
    %5 = vector.shape_cast %4 : vector<1x1x96xf32> to vector<1x96xf32>
    %6 = vector.broadcast %5 : vector<1x96xf32> to vector<16x96xf32>
    %7 = arith.addf %3, %6 : vector<16x96xf32>
    %c0_7 = arith.constant 0 : index
    %c0_8 = arith.constant 0 : index
    %c0_9 = arith.constant 0 : index
    %8 = vector.load %arg1[%c0_7, %c0_8, %c0_9] : memref<2x1x8xf32, #tpu.memory_space<vmem>>, vector<1x1x8xf32>
    %9 = vector.shape_cast %8 : vector<1x1x8xf32> to vector<1x8xf32>
    %10 = vector.extract_strided_slice %7 {offsets = [0, 0], sizes = [8, 8], strides = [1, 1]} : vector<16x96xf32> to vector<8x8xf32>
    %11 = vector.extract_strided_slice %7 {offsets = [0, 32], sizes = [8, 8], strides = [1, 1]} : vector<16x96xf32> to vector<8x8xf32>
    %12 = vector.extract_strided_slice %7 {offsets = [0, 64], sizes = [8, 8], strides = [1, 1]} : vector<16x96xf32> to vector<8x8xf32>
    "tpu.trace_start"() <{level = 10 : i32, message = "qd,kd->qk"}> : () -> ()
    %cst_10 = arith.constant dense<0.000000e+00> : vector<8x8xf32>
    %13 = tpu.matmul %10, %11, %cst_10 {dimension_numbers = #tpu.dot_dimension_numbers<[1], [1], [0], [0], [0, 0, 1, 0], [], []>} : vector<8x8xf32>, vector<8x8xf32>, vector<8x8xf32> -> vector<8x8xf32>
    "tpu.trace_stop"() : () -> ()
    %14 = vector.broadcast %9 : vector<1x8xf32> to vector<8x8xf32>
    %15 = arith.addf %13, %14 : vector<8x8xf32>
    %cst_11 = arith.constant dense<0xFF800000> : vector<8xf32>
    %16 = vector.multi_reduction <maximumf>, %15, %cst_11 [1] : vector<8x8xf32> to vector<8xf32>
    %17 = vector.shape_cast %16 : vector<8xf32> to vector<8x1xf32>
    %18 = vector.broadcast %17 : vector<8x1xf32> to vector<8x8xf32>
    %19 = arith.subf %15, %18 : vector<8x8xf32>
    %20 = math.exp %19 : vector<8x8xf32>
    %cst_12 = arith.constant dense<0.000000e+00> : vector<8xf32>
    %21 = vector.multi_reduction <add>, %20, %cst_12 [1] : vector<8x8xf32> to vector<8xf32>
    %22 = vector.shape_cast %21 : vector<8xf32> to vector<8x1xf32>
    %23 = tpu.reciprocal %22 {approx = true} : vector<8x1xf32> -> vector<8x1xf32>
    %24 = vector.broadcast %23 : vector<8x1xf32> to vector<8x8xf32>
    %25 = arith.mulf %20, %24 : vector<8x8xf32>
    %cst_13 = arith.constant dense<0.000000e+00> : vector<8x8xf32>
    %26 = tpu.matmul %25, %12, %cst_13 {dimension_numbers = #tpu.dot_dimension_numbers<[1], [0], [0], [1], [0, 0, 1, 1], [], []>} : vector<8x8xf32>, vector<8x8xf32>, vector<8x8xf32> -> vector<8x8xf32>
    %c0_14 = arith.constant 0 : index
    %c0_15 = arith.constant 0 : index
    %27 = vector.load %arg15[%c0_14, %c0_15] : memref<16x32xf32, #tpu.memory_space<vmem>>, vector<8x8xf32>
    tpu.vector_store %arg15[%c0_14, %c0_15], %26 {strides = array<i32>} : memref<16x32xf32, #tpu.memory_space<vmem>>, vector<8x8xf32>,
    %28 = vector.extract_strided_slice %7 {offsets = [0, 8], sizes = [8, 8], strides = [1, 1]} : vector<16x96xf32> to vector<8x8xf32>
    %29 = vector.extract_strided_slice %7 {offsets = [0, 40], sizes = [8, 8], strides = [1, 1]} : vector<16x96xf32> to vector<8x8xf32>
    %30 = vector.extract_strided_slice %7 {offsets = [0, 72], sizes = [8, 8], strides = [1, 1]} : vector<16x96xf32> to vector<8x8xf32>
    "tpu.trace_start"() <{level = 10 : i32, message = "qd,kd->qk"}> : () -> ()
    %cst_16 = arith.constant dense<0.000000e+00> : vector<8x8xf32>
    %31 = tpu.matmul %28, %29, %cst_16 {dimension_numbers = #tpu.dot_dimension_numbers<[1], [1], [0], [0], [0, 0, 1, 0], [], []>} : vector<8x8xf32>, vector<8x8xf32>, vector<8x8xf32> -> vector<8x8xf32>
    "tpu.trace_stop"() : () -> ()
    %32 = vector.broadcast %9 : vector<1x8xf32> to vector<8x8xf32>
    %33 = arith.addf %31, %32 : vector<8x8xf32>
    %cst_17 = arith.constant dense<0xFF800000> : vector<8xf32>
    %34 = vector.multi_reduction <maximumf>, %33, %cst_17 [1] : vector<8x8xf32> to vector<8xf32>
    %35 = vector.shape_cast %34 : vector<8xf32> to vector<8x1xf32>
    %36 = vector.broadcast %35 : vector<8x1xf32> to vector<8x8xf32>
    %37 = arith.subf %33, %36 : vector<8x8xf32>
    %38 = math.exp %37 : vector<8x8xf32>
    %cst_18 = arith.constant dense<0.000000e+00> : vector<8xf32>
    %39 = vector.multi_reduction <add>, %38, %cst_18 [1] : vector<8x8xf32> to vector<8xf32>
    %40 = vector.shape_cast %39 : vector<8xf32> to vector<8x1xf32>
    %41 = tpu.reciprocal %40 {approx = true} : vector<8x1xf32> -> vector<8x1xf32>
    %42 = vector.broadcast %41 : vector<8x1xf32> to vector<8x8xf32>
    %43 = arith.mulf %38, %42 : vector<8x8xf32>
    %cst_19 = arith.constant dense<0.000000e+00> : vector<8x8xf32>
    %44 = tpu.matmul %43, %30, %cst_19 {dimension_numbers = #tpu.dot_dimension_numbers<[1], [0], [0], [1], [0, 0, 1, 1], [], []>} : vector<8x8xf32>, vector<8x8xf32>, vector<8x8xf32> -> vector<8x8xf32>
    %c0_20 = arith.constant 0 : index
    %c8 = arith.constant 8 : index
    %45 = vector.load %arg15[%c0_20, %c8] : memref<16x32xf32, #tpu.memory_space<vmem>>, vector<8x8xf32>
    tpu.vector_store %arg15[%c0_20, %c8], %44 {strides = array<i32>} : memref<16x32xf32, #tpu.memory_space<vmem>>, vector<8x8xf32>,
    %46 = vector.extract_strided_slice %7 {offsets = [0, 16], sizes = [8, 8], strides = [1, 1]} : vector<16x96xf32> to vector<8x8xf32>
    %47 = vector.extract_strided_slice %7 {offsets = [0, 48], sizes = [8, 8], strides = [1, 1]} : vector<16x96xf32> to vector<8x8xf32>
    %48 = vector.extract_strided_slice %7 {offsets = [0, 80], sizes = [8, 8], strides = [1, 1]} : vector<16x96xf32> to vector<8x8xf32>
    "tpu.trace_start"() <{level = 10 : i32, message = "qd,kd->qk"}> : () -> ()
    %cst_21 = arith.constant dense<0.000000e+00> : vector<8x8xf32>
    %49 = tpu.matmul %46, %47, %cst_21 {dimension_numbers = #tpu.dot_dimension_numbers<[1], [1], [0], [0], [0, 0, 1, 0], [], []>} : vector<8x8xf32>, vector<8x8xf32>, vector<8x8xf32> -> vector<8x8xf32>
    "tpu.trace_stop"() : () -> ()
    %50 = vector.broadcast %9 : vector<1x8xf32> to vector<8x8xf32>
    %51 = arith.addf %49, %50 : vector<8x8xf32>
    %cst_22 = arith.constant dense<0xFF800000> : vector<8xf32>
    %52 = vector.multi_reduction <maximumf>, %51, %cst_22 [1] : vector<8x8xf32> to vector<8xf32>
    %53 = vector.shape_cast %52 : vector<8xf32> to vector<8x1xf32>
    %54 = vector.broadcast %53 : vector<8x1xf32> to vector<8x8xf32>
    %55 = arith.subf %51, %54 : vector<8x8xf32>
    %56 = math.exp %55 : vector<8x8xf32>
    %cst_23 = arith.constant dense<0.000000e+00> : vector<8xf32>
    %57 = vector.multi_reduction <add>, %56, %cst_23 [1] : vector<8x8xf32> to vector<8xf32>
    %58 = vector.shape_cast %57 : vector<8xf32> to vector<8x1xf32>
    %59 = tpu.reciprocal %58 {approx = true} : vector<8x1xf32> -> vector<8x1xf32>
    %60 = vector.broadcast %59 : vector<8x1xf32> to vector<8x8xf32>
    %61 = arith.mulf %56, %60 : vector<8x8xf32>
    %cst_24 = arith.constant dense<0.000000e+00> : vector<8x8xf32>
    %62 = tpu.matmul %61, %48, %cst_24 {dimension_numbers = #tpu.dot_dimension_numbers<[1], [0], [0], [1], [0, 0, 1, 1], [], []>} : vector<8x8xf32>, vector<8x8xf32>, vector<8x8xf32> -> vector<8x8xf32>
    %c0_25 = arith.constant 0 : index
    %c16 = arith.constant 16 : index
    %63 = vector.load %arg15[%c0_25, %c16] : memref<16x32xf32, #tpu.memory_space<vmem>>, vector<8x8xf32>
    tpu.vector_store %arg15[%c0_25, %c16], %62 {strides = array<i32>} : memref<16x32xf32, #tpu.memory_space<vmem>>, vector<8x8xf32>,
    %64 = vector.extract_strided_slice %7 {offsets = [0, 24], sizes = [8, 8], strides = [1, 1]} : vector<16x96xf32> to vector<8x8xf32>
    %65 = vector.extract_strided_slice %7 {offsets = [0, 56], sizes = [8, 8], strides = [1, 1]} : vector<16x96xf32> to vector<8x8xf32>
    %66 = vector.extract_strided_slice %7 {offsets = [0, 88], sizes = [8, 8], strides = [1, 1]} : vector<16x96xf32> to vector<8x8xf32>
    "tpu.trace_start"() <{level = 10 : i32, message = "qd,kd->qk"}> : () -> ()
    %cst_26 = arith.constant dense<0.000000e+00> : vector<8x8xf32>
    %67 = tpu.matmul %64, %65, %cst_26 {dimension_numbers = #tpu.dot_dimension_numbers<[1], [1], [0], [0], [0, 0, 1, 0], [], []>} : vector<8x8xf32>, vector<8x8xf32>, vector<8x8xf32> -> vector<8x8xf32>
    "tpu.trace_stop"() : () -> ()
    %68 = vector.broadcast %9 : vector<1x8xf32> to vector<8x8xf32>
    %69 = arith.addf %67, %68 : vector<8x8xf32>
    %cst_27 = arith.constant dense<0xFF800000> : vector<8xf32>
    %70 = vector.multi_reduction <maximumf>, %69, %cst_27 [1] : vector<8x8xf32> to vector<8xf32>
    %71 = vector.shape_cast %70 : vector<8xf32> to vector<8x1xf32>
    %72 = vector.broadcast %71 : vector<8x1xf32> to vector<8x8xf32>
    %73 = arith.subf %69, %72 : vector<8x8xf32>
    %74 = math.exp %73 : vector<8x8xf32>
    %cst_28 = arith.constant dense<0.000000e+00> : vector<8xf32>
    %75 = vector.multi_reduction <add>, %74, %cst_28 [1] : vector<8x8xf32> to vector<8xf32>
    %76 = vector.shape_cast %75 : vector<8xf32> to vector<8x1xf32>
    %77 = tpu.reciprocal %76 {approx = true} : vector<8x1xf32> -> vector<8x1xf32>
    %78 = vector.broadcast %77 : vector<8x1xf32> to vector<8x8xf32>
    %79 = arith.mulf %74, %78 : vector<8x8xf32>
    %cst_29 = arith.constant dense<0.000000e+00> : vector<8x8xf32>
    %80 = tpu.matmul %79, %66, %cst_29 {dimension_numbers = #tpu.dot_dimension_numbers<[1], [0], [0], [1], [0, 0, 1, 1], [], []>} : vector<8x8xf32>, vector<8x8xf32>, vector<8x8xf32> -> vector<8x8xf32>
    %c0_30 = arith.constant 0 : index
    %c24 = arith.constant 24 : index
    %81 = vector.load %arg15[%c0_30, %c24] : memref<16x32xf32, #tpu.memory_space<vmem>>, vector<8x8xf32>
    tpu.vector_store %arg15[%c0_30, %c24], %80 {strides = array<i32>} : memref<16x32xf32, #tpu.memory_space<vmem>>, vector<8x8xf32>,
    %c1 = arith.constant 1 : index
    %c0_31 = arith.constant 0 : index
    %c0_32 = arith.constant 0 : index
    %82 = vector.load %arg1[%c1, %c0_31, %c0_32] : memref<2x1x8xf32, #tpu.memory_space<vmem>>, vector<1x1x8xf32>
    %83 = vector.shape_cast %82 : vector<1x1x8xf32> to vector<1x8xf32>
    %84 = vector.extract_strided_slice %7 {offsets = [8, 0], sizes = [8, 8], strides = [1, 1]} : vector<16x96xf32> to vector<8x8xf32>
    %85 = vector.extract_strided_slice %7 {offsets = [8, 32], sizes = [8, 8], strides = [1, 1]} : vector<16x96xf32> to vector<8x8xf32>
    %86 = vector.extract_strided_slice %7 {offsets = [8, 64], sizes = [8, 8], strides = [1, 1]} : vector<16x96xf32> to vector<8x8xf32>
    "tpu.trace_start"() <{level = 10 : i32, message = "qd,kd->qk"}> : () -> ()
    %cst_33 = arith.constant dense<0.000000e+00> : vector<8x8xf32>
    %87 = tpu.matmul %84, %85, %cst_33 {dimension_numbers = #tpu.dot_dimension_numbers<[1], [1], [0], [0], [0, 0, 1, 0], [], []>} : vector<8x8xf32>, vector<8x8xf32>, vector<8x8xf32> -> vector<8x8xf32>
    "tpu.trace_stop"() : () -> ()
    %88 = vector.broadcast %83 : vector<1x8xf32> to vector<8x8xf32>
    %89 = arith.addf %87, %88 : vector<8x8xf32>
    %cst_34 = arith.constant dense<0xFF800000> : vector<8xf32>
    %90 = vector.multi_reduction <maximumf>, %89, %cst_34 [1] : vector<8x8xf32> to vector<8xf32>
    %91 = vector.shape_cast %90 : vector<8xf32> to vector<8x1xf32>
    %92 = vector.broadcast %91 : vector<8x1xf32> to vector<8x8xf32>
    %93 = arith.subf %89, %92 : vector<8x8xf32>
    %94 = math.exp %93 : vector<8x8xf32>
    %cst_35 = arith.constant dense<0.000000e+00> : vector<8xf32>
    %95 = vector.multi_reduction <add>, %94, %cst_35 [1] : vector<8x8xf32> to vector<8xf32>
    %96 = vector.shape_cast %95 : vector<8xf32> to vector<8x1xf32>
    %97 = tpu.reciprocal %96 {approx = true} : vector<8x1xf32> -> vector<8x1xf32>
    %98 = vector.broadcast %97 : vector<8x1xf32> to vector<8x8xf32>
    %99 = arith.mulf %94, %98 : vector<8x8xf32>
    %cst_36 = arith.constant dense<0.000000e+00> : vector<8x8xf32>
    %100 = tpu.matmul %99, %86, %cst_36 {dimension_numbers = #tpu.dot_dimension_numbers<[1], [0], [0], [1], [0, 0, 1, 1], [], []>} : vector<8x8xf32>, vector<8x8xf32>, vector<8x8xf32> -> vector<8x8xf32>
    %c8_37 = arith.constant 8 : index
    %c0_38 = arith.constant 0 : index
    %101 = vector.load %arg15[%c8_37, %c0_38] : memref<16x32xf32, #tpu.memory_space<vmem>>, vector<8x8xf32>
    tpu.vector_store %arg15[%c8_37, %c0_38], %100 {strides = array<i32>} : memref<16x32xf32, #tpu.memory_space<vmem>>, vector<8x8xf32>,
    %102 = vector.extract_strided_slice %7 {offsets = [8, 8], sizes = [8, 8], strides = [1, 1]} : vector<16x96xf32> to vector<8x8xf32>
    %103 = vector.extract_strided_slice %7 {offsets = [8, 40], sizes = [8, 8], strides = [1, 1]} : vector<16x96xf32> to vector<8x8xf32>
    %104 = vector.extract_strided_slice %7 {offsets = [8, 72], sizes = [8, 8], strides = [1, 1]} : vector<16x96xf32> to vector<8x8xf32>
    "tpu.trace_start"() <{level = 10 : i32, message = "qd,kd->qk"}> : () -> ()
    %cst_39 = arith.constant dense<0.000000e+00> : vector<8x8xf32>
    %105 = tpu.matmul %102, %103, %cst_39 {dimension_numbers = #tpu.dot_dimension_numbers<[1], [1], [0], [0], [0, 0, 1, 0], [], []>} : vector<8x8xf32>, vector<8x8xf32>, vector<8x8xf32> -> vector<8x8xf32>
    "tpu.trace_stop"() : () -> ()
    %106 = vector.broadcast %83 : vector<1x8xf32> to vector<8x8xf32>
    %107 = arith.addf %105, %106 : vector<8x8xf32>
    %cst_40 = arith.constant dense<0xFF800000> : vector<8xf32>
    %108 = vector.multi_reduction <maximumf>, %107, %cst_40 [1] : vector<8x8xf32> to vector<8xf32>
    %109 = vector.shape_cast %108 : vector<8xf32> to vector<8x1xf32>
    %110 = vector.broadcast %109 : vector<8x1xf32> to vector<8x8xf32>
    %111 = arith.subf %107, %110 : vector<8x8xf32>
    %112 = math.exp %111 : vector<8x8xf32>
    %cst_41 = arith.constant dense<0.000000e+00> : vector<8xf32>
    %113 = vector.multi_reduction <add>, %112, %cst_41 [1] : vector<8x8xf32> to vector<8xf32>
    %114 = vector.shape_cast %113 : vector<8xf32> to vector<8x1xf32>
    %115 = tpu.reciprocal %114 {approx = true} : vector<8x1xf32> -> vector<8x1xf32>
    %116 = vector.broadcast %115 : vector<8x1xf32> to vector<8x8xf32>
    %117 = arith.mulf %112, %116 : vector<8x8xf32>
    %cst_42 = arith.constant dense<0.000000e+00> : vector<8x8xf32>
    %118 = tpu.matmul %117, %104, %cst_42 {dimension_numbers = #tpu.dot_dimension_numbers<[1], [0], [0], [1], [0, 0, 1, 1], [], []>} : vector<8x8xf32>, vector<8x8xf32>, vector<8x8xf32> -> vector<8x8xf32>
    %c8_43 = arith.constant 8 : index
    %c8_44 = arith.constant 8 : index
    %119 = vector.load %arg15[%c8_43, %c8_44] : memref<16x32xf32, #tpu.memory_space<vmem>>, vector<8x8xf32>
    tpu.vector_store %arg15[%c8_43, %c8_44], %118 {strides = array<i32>} : memref<16x32xf32, #tpu.memory_space<vmem>>, vector<8x8xf32>,
    %120 = vector.extract_strided_slice %7 {offsets = [8, 16], sizes = [8, 8], strides = [1, 1]} : vector<16x96xf32> to vector<8x8xf32>
    %121 = vector.extract_strided_slice %7 {offsets = [8, 48], sizes = [8, 8], strides = [1, 1]} : vector<16x96xf32> to vector<8x8xf32>
    %122 = vector.extract_strided_slice %7 {offsets = [8, 80], sizes = [8, 8], strides = [1, 1]} : vector<16x96xf32> to vector<8x8xf32>
    "tpu.trace_start"() <{level = 10 : i32, message = "qd,kd->qk"}> : () -> ()
    %cst_45 = arith.constant dense<0.000000e+00> : vector<8x8xf32>
    %123 = tpu.matmul %120, %121, %cst_45 {dimension_numbers = #tpu.dot_dimension_numbers<[1], [1], [0], [0], [0, 0, 1, 0], [], []>} : vector<8x8xf32>, vector<8x8xf32>, vector<8x8xf32> -> vector<8x8xf32>
    "tpu.trace_stop"() : () -> ()
    %124 = vector.broadcast %83 : vector<1x8xf32> to vector<8x8xf32>
    %125 = arith.addf %123, %124 : vector<8x8xf32>
    %cst_46 = arith.constant dense<0xFF800000> : vector<8xf32>
    %126 = vector.multi_reduction <maximumf>, %125, %cst_46 [1] : vector<8x8xf32> to vector<8xf32>
    %127 = vector.shape_cast %126 : vector<8xf32> to vector<8x1xf32>
    %128 = vector.broadcast %127 : vector<8x1xf32> to vector<8x8xf32>
    %129 = arith.subf %125, %128 : vector<8x8xf32>
    %130 = math.exp %129 : vector<8x8xf32>
    %cst_47 = arith.constant dense<0.000000e+00> : vector<8xf32>
    %131 = vector.multi_reduction <add>, %130, %cst_47 [1] : vector<8x8xf32> to vector<8xf32>
    %132 = vector.shape_cast %131 : vector<8xf32> to vector<8x1xf32>
    %133 = tpu.reciprocal %132 {approx = true} : vector<8x1xf32> -> vector<8x1xf32>
    %134 = vector.broadcast %133 : vector<8x1xf32> to vector<8x8xf32>
    %135 = arith.mulf %130, %134 : vector<8x8xf32>
    %cst_48 = arith.constant dense<0.000000e+00> : vector<8x8xf32>
    %136 = tpu.matmul %135, %122, %cst_48 {dimension_numbers = #tpu.dot_dimension_numbers<[1], [0], [0], [1], [0, 0, 1, 1], [], []>} : vector<8x8xf32>, vector<8x8xf32>, vector<8x8xf32> -> vector<8x8xf32>
    %c8_49 = arith.constant 8 : index
    %c16_50 = arith.constant 16 : index
    %137 = vector.load %arg15[%c8_49, %c16_50] : memref<16x32xf32, #tpu.memory_space<vmem>>, vector<8x8xf32>
    tpu.vector_store %arg15[%c8_49, %c16_50], %136 {strides = array<i32>} : memref<16x32xf32, #tpu.memory_space<vmem>>, vector<8x8xf32>,
    %138 = vector.extract_strided_slice %7 {offsets = [8, 24], sizes = [8, 8], strides = [1, 1]} : vector<16x96xf32> to vector<8x8xf32>
    %139 = vector.extract_strided_slice %7 {offsets = [8, 56], sizes = [8, 8], strides = [1, 1]} : vector<16x96xf32> to vector<8x8xf32>
    %140 = vector.extract_strided_slice %7 {offsets = [8, 88], sizes = [8, 8], strides = [1, 1]} : vector<16x96xf32> to vector<8x8xf32>
    "tpu.trace_start"() <{level = 10 : i32, message = "qd,kd->qk"}> : () -> ()
    %cst_51 = arith.constant dense<0.000000e+00> : vector<8x8xf32>
    %141 = tpu.matmul %138, %139, %cst_51 {dimension_numbers = #tpu.dot_dimension_numbers<[1], [1], [0], [0], [0, 0, 1, 0], [], []>} : vector<8x8xf32>, vector<8x8xf32>, vector<8x8xf32> -> vector<8x8xf32>
    "tpu.trace_stop"() : () -> ()
    %142 = vector.broadcast %83 : vector<1x8xf32> to vector<8x8xf32>
    %143 = arith.addf %141, %142 : vector<8x8xf32>
    %cst_52 = arith.constant dense<0xFF800000> : vector<8xf32>
    %144 = vector.multi_reduction <maximumf>, %143, %cst_52 [1] : vector<8x8xf32> to vector<8xf32>
    %145 = vector.shape_cast %144 : vector<8xf32> to vector<8x1xf32>
    %146 = vector.broadcast %145 : vector<8x1xf32> to vector<8x8xf32>
    %147 = arith.subf %143, %146 : vector<8x8xf32>
    %148 = math.exp %147 : vector<8x8xf32>
    %cst_53 = arith.constant dense<0.000000e+00> : vector<8xf32>
    %149 = vector.multi_reduction <add>, %148, %cst_53 [1] : vector<8x8xf32> to vector<8xf32>
    %150 = vector.shape_cast %149 : vector<8xf32> to vector<8x1xf32>
    %151 = tpu.reciprocal %150 {approx = true} : vector<8x1xf32> -> vector<8x1xf32>
    %152 = vector.broadcast %151 : vector<8x1xf32> to vector<8x8xf32>
    %153 = arith.mulf %148, %152 : vector<8x8xf32>
    %cst_54 = arith.constant dense<0.000000e+00> : vector<8x8xf32>
    %154 = tpu.matmul %153, %140, %cst_54 {dimension_numbers = #tpu.dot_dimension_numbers<[1], [0], [0], [1], [0, 0, 1, 1], [], []>} : vector<8x8xf32>, vector<8x8xf32>, vector<8x8xf32> -> vector<8x8xf32>
    %c8_55 = arith.constant 8 : index
    %c24_56 = arith.constant 24 : index
    %155 = vector.load %arg15[%c8_55, %c24_56] : memref<16x32xf32, #tpu.memory_space<vmem>>, vector<8x8xf32>
    tpu.vector_store %arg15[%c8_55, %c24_56], %154 {strides = array<i32>} : memref<16x32xf32, #tpu.memory_space<vmem>>, vector<8x8xf32>,
    %c0_57 = arith.constant 0 : index
    %c0_58 = arith.constant 0 : index
    %156 = vector.load %arg15[%c0_57, %c0_58] : memref<16x32xf32, #tpu.memory_space<vmem>>, vector<16x32xf32>
    %c0_59 = arith.constant 0 : index
    %c0_60 = arith.constant 0 : index
    %c0_61 = arith.constant 0 : index
    %157 = vector.load %arg4[%c0_59, %c0_60, %c0_61] : memref<2x32x32xf32, #tpu.memory_space<vmem>>, vector<1x32x32xf32>
    %158 = vector.shape_cast %157 : vector<1x32x32xf32> to vector<32x32xf32>
    %cst_62 = arith.constant dense<0.000000e+00> : vector<16x32xf32>
    %159 = tpu.matmul %156, %158, %cst_62 {dimension_numbers = #tpu.dot_dimension_numbers<[1], [0], [0], [1], [0, 0, 1, 1], [], []>} : vector<16x32xf32>, vector<32x32xf32>, vector<16x32xf32> -> vector<16x32xf32>
    %c0_63 = arith.constant 0 : index
    %c0_64 = arith.constant 0 : index
    %c0_65 = arith.constant 0 : index
    %160 = vector.load %arg5[%c0_63, %c0_64, %c0_65] : memref<2x1x32xf32, #tpu.memory_space<vmem>>, vector<1x1x32xf32>
    %161 = vector.shape_cast %160 : vector<1x1x32xf32> to vector<1x32xf32>
    %162 = vector.broadcast %161 : vector<1x32xf32> to vector<16x32xf32>
    %163 = arith.addf %159, %162 : vector<16x32xf32>
    %164 = arith.addf %0, %163 : vector<16x32xf32>
    %cst_66 = arith.constant dense<0.000000e+00> : vector<16xf32>
    %165 = vector.multi_reduction <add>, %164, %cst_66 [1] : vector<16x32xf32> to vector<16xf32>
    %166 = vector.shape_cast %165 : vector<16xf32> to vector<16x1xf32>
    %cst_67 = arith.constant 3.200000e+01 : f32
    %167 = vector.broadcast %cst_67 : f32 to vector<16x1xf32>
    %168 = arith.divf %166, %167 : vector<16x1xf32>
    %169 = vector.broadcast %168 : vector<16x1xf32> to vector<16x32xf32>
    %170 = arith.subf %164, %169 : vector<16x32xf32>
    %171 = arith.mulf %170, %170 : vector<16x32xf32>
    %cst_68 = arith.constant dense<0.000000e+00> : vector<16xf32>
    %172 = vector.multi_reduction <add>, %171, %cst_68 [1] : vector<16x32xf32> to vector<16xf32>
    %173 = vector.shape_cast %172 : vector<16xf32> to vector<16x1xf32>
    %cst_69 = arith.constant 3.200000e+01 : f32
    %174 = vector.broadcast %cst_69 : f32 to vector<16x1xf32>
    %175 = arith.divf %173, %174 : vector<16x1xf32>
    %cst_70 = arith.constant 9.99999974E-6 : f32
    %176 = vector.broadcast %cst_70 : f32 to vector<16x1xf32>
    %177 = arith.addf %175, %176 : vector<16x1xf32>
    %178 = math.rsqrt %177 : vector<16x1xf32>
    %179 = vector.broadcast %178 : vector<16x1xf32> to vector<16x32xf32>
    %180 = arith.mulf %170, %179 : vector<16x32xf32>
    %c0_71 = arith.constant 0 : index
    %c0_72 = arith.constant 0 : index
    %c0_73 = arith.constant 0 : index
    %181 = vector.load %arg6[%c0_71, %c0_72, %c0_73] : memref<2x1x32xf32, #tpu.memory_space<vmem>>, vector<1x1x32xf32>
    %182 = vector.shape_cast %181 : vector<1x1x32xf32> to vector<1x32xf32>
    %183 = vector.broadcast %182 : vector<1x32xf32> to vector<16x32xf32>
    %184 = arith.mulf %180, %183 : vector<16x32xf32>
    %c0_74 = arith.constant 0 : index
    %c0_75 = arith.constant 0 : index
    %c0_76 = arith.constant 0 : index
    %185 = vector.load %arg7[%c0_74, %c0_75, %c0_76] : memref<2x1x32xf32, #tpu.memory_space<vmem>>, vector<1x1x32xf32>
    %186 = vector.shape_cast %185 : vector<1x1x32xf32> to vector<1x32xf32>
    %187 = vector.broadcast %186 : vector<1x32xf32> to vector<16x32xf32>
    %188 = arith.addf %184, %187 : vector<16x32xf32>
    %c0_77 = arith.constant 0 : index
    %c0_78 = arith.constant 0 : index
    %c0_79 = arith.constant 0 : index
    %189 = vector.load %arg8[%c0_77, %c0_78, %c0_79] : memref<2x32x64xf32, #tpu.memory_space<vmem>>, vector<1x32x64xf32>
    %190 = vector.shape_cast %189 : vector<1x32x64xf32> to vector<32x64xf32>
    %cst_80 = arith.constant dense<0.000000e+00> : vector<16x64xf32>
    %191 = tpu.matmul %188, %190, %cst_80 {dimension_numbers = #tpu.dot_dimension_numbers<[1], [0], [0], [1], [0, 0, 1, 1], [], []>} : vector<16x32xf32>, vector<32x64xf32>, vector<16x64xf32> -> vector<16x64xf32>
    %c0_81 = arith.constant 0 : index
    %c0_82 = arith.constant 0 : index
    %c0_83 = arith.constant 0 : index
    %192 = vector.load %arg9[%c0_81, %c0_82, %c0_83] : memref<2x1x64xf32, #tpu.memory_space<vmem>>, vector<1x1x64xf32>
    %193 = vector.shape_cast %192 : vector<1x1x64xf32> to vector<1x64xf32>
    %194 = vector.broadcast %193 : vector<1x64xf32> to vector<16x64xf32>
    %195 = arith.addf %191, %194 : vector<16x64xf32>
    %cst_84 = arith.constant 0.000000e+00 : f32
    %196 = vector.broadcast %cst_84 : f32 to vector<16x64xf32>
    %197 = arith.maximumf %195, %196 : vector<16x64xf32>
    %c0_85 = arith.constant 0 : index
    %c0_86 = arith.constant 0 : index
    %c0_87 = arith.constant 0 : index
    %198 = vector.load %arg10[%c0_85, %c0_86, %c0_87] : memref<2x64x32xf32, #tpu.memory_space<vmem>>, vector<1x64x32xf32>
    %199 = vector.shape_cast %198 : vector<1x64x32xf32> to vector<64x32xf32>
    %cst_88 = arith.constant dense<0.000000e+00> : vector<16x32xf32>
    %200 = tpu.matmul %197, %199, %cst_88 {dimension_numbers = #tpu.dot_dimension_numbers<[1], [0], [0], [1], [0, 0, 1, 1], [], []>} : vector<16x64xf32>, vector<64x32xf32>, vector<16x32xf32> -> vector<16x32xf32>
    %c0_89 = arith.constant 0 : index
    %c0_90 = arith.constant 0 : index
    %c0_91 = arith.constant 0 : index
    %201 = vector.load %arg11[%c0_89, %c0_90, %c0_91] : memref<2x1x32xf32, #tpu.memory_space<vmem>>, vector<1x1x32xf32>
    %202 = vector.shape_cast %201 : vector<1x1x32xf32> to vector<1x32xf32>
    %203 = vector.broadcast %202 : vector<1x32xf32> to vector<16x32xf32>
    %204 = arith.addf %200, %203 : vector<16x32xf32>
    %205 = arith.addf %188, %204 : vector<16x32xf32>
    %cst_92 = arith.constant dense<0.000000e+00> : vector<16xf32>
    %206 = vector.multi_reduction <add>, %205, %cst_92 [1] : vector<16x32xf32> to vector<16xf32>
    %207 = vector.shape_cast %206 : vector<16xf32> to vector<16x1xf32>
    %cst_93 = arith.constant 3.200000e+01 : f32
    %208 = vector.broadcast %cst_93 : f32 to vector<16x1xf32>
    %209 = arith.divf %207, %208 : vector<16x1xf32>
    %210 = vector.broadcast %209 : vector<16x1xf32> to vector<16x32xf32>
    %211 = arith.subf %205, %210 : vector<16x32xf32>
    %212 = arith.mulf %211, %211 : vector<16x32xf32>
    %cst_94 = arith.constant dense<0.000000e+00> : vector<16xf32>
    %213 = vector.multi_reduction <add>, %212, %cst_94 [1] : vector<16x32xf32> to vector<16xf32>
    %214 = vector.shape_cast %213 : vector<16xf32> to vector<16x1xf32>
    %cst_95 = arith.constant 3.200000e+01 : f32
    %215 = vector.broadcast %cst_95 : f32 to vector<16x1xf32>
    %216 = arith.divf %214, %215 : vector<16x1xf32>
    %cst_96 = arith.constant 9.99999974E-6 : f32
    %217 = vector.broadcast %cst_96 : f32 to vector<16x1xf32>
    %218 = arith.addf %216, %217 : vector<16x1xf32>
    %219 = math.rsqrt %218 : vector<16x1xf32>
    %220 = vector.broadcast %219 : vector<16x1xf32> to vector<16x32xf32>
    %221 = arith.mulf %211, %220 : vector<16x32xf32>
    %c0_97 = arith.constant 0 : index
    %c0_98 = arith.constant 0 : index
    %c0_99 = arith.constant 0 : index
    %222 = vector.load %arg12[%c0_97, %c0_98, %c0_99] : memref<2x1x32xf32, #tpu.memory_space<vmem>>, vector<1x1x32xf32>
    %223 = vector.shape_cast %222 : vector<1x1x32xf32> to vector<1x32xf32>
    %224 = vector.broadcast %223 : vector<1x32xf32> to vector<16x32xf32>
    %225 = arith.mulf %221, %224 : vector<16x32xf32>
    %c0_100 = arith.constant 0 : index
    %c0_101 = arith.constant 0 : index
    %c0_102 = arith.constant 0 : index
    %226 = vector.load %arg13[%c0_100, %c0_101, %c0_102] : memref<2x1x32xf32, #tpu.memory_space<vmem>>, vector<1x1x32xf32>
    %227 = vector.shape_cast %226 : vector<1x1x32xf32> to vector<1x32xf32>
    %228 = vector.broadcast %227 : vector<1x32xf32> to vector<16x32xf32>
    %229 = arith.addf %225, %228 : vector<16x32xf32>
    %c1_103 = arith.constant 1 : index
    %c0_104 = arith.constant 0 : index
    %c0_105 = arith.constant 0 : index
    %230 = vector.load %arg2[%c1_103, %c0_104, %c0_105] : memref<2x32x96xf32, #tpu.memory_space<vmem>>, vector<1x32x96xf32>
    %231 = vector.shape_cast %230 : vector<1x32x96xf32> to vector<32x96xf32>
    %cst_106 = arith.constant dense<0.000000e+00> : vector<16x96xf32>
    %232 = tpu.matmul %229, %231, %cst_106 {dimension_numbers = #tpu.dot_dimension_numbers<[1], [0], [0], [1], [0, 0, 1, 1], [], []>} : vector<16x32xf32>, vector<32x96xf32>, vector<16x96xf32> -> vector<16x96xf32>
    %c1_107 = arith.constant 1 : index
    %c0_108 = arith.constant 0 : index
    %c0_109 = arith.constant 0 : index
    %233 = vector.load %arg3[%c1_107, %c0_108, %c0_109] : memref<2x1x96xf32, #tpu.memory_space<vmem>>, vector<1x1x96xf32>
    %234 = vector.shape_cast %233 : vector<1x1x96xf32> to vector<1x96xf32>
    %235 = vector.broadcast %234 : vector<1x96xf32> to vector<16x96xf32>
    %236 = arith.addf %232, %235 : vector<16x96xf32>
    %c0_110 = arith.constant 0 : index
    %c0_111 = arith.constant 0 : index
    %c0_112 = arith.constant 0 : index
    %237 = vector.load %arg1[%c0_110, %c0_111, %c0_112] : memref<2x1x8xf32, #tpu.memory_space<vmem>>, vector<1x1x8xf32>
    %238 = vector.shape_cast %237 : vector<1x1x8xf32> to vector<1x8xf32>
    %239 = vector.extract_strided_slice %236 {offsets = [0, 0], sizes = [8, 8], strides = [1, 1]} : vector<16x96xf32> to vector<8x8xf32>
    %240 = vector.extract_strided_slice %236 {offsets = [0, 32], sizes = [8, 8], strides = [1, 1]} : vector<16x96xf32> to vector<8x8xf32>
    %241 = vector.extract_strided_slice %236 {offsets = [0, 64], sizes = [8, 8], strides = [1, 1]} : vector<16x96xf32> to vector<8x8xf32>
    "tpu.trace_start"() <{level = 10 : i32, message = "qd,kd->qk"}> : () -> ()
    %cst_113 = arith.constant dense<0.000000e+00> : vector<8x8xf32>
    %242 = tpu.matmul %239, %240, %cst_113 {dimension_numbers = #tpu.dot_dimension_numbers<[1], [1], [0], [0], [0, 0, 1, 0], [], []>} : vector<8x8xf32>, vector<8x8xf32>, vector<8x8xf32> -> vector<8x8xf32>
    "tpu.trace_stop"() : () -> ()
    %243 = vector.broadcast %238 : vector<1x8xf32> to vector<8x8xf32>
    %244 = arith.addf %242, %243 : vector<8x8xf32>
    %cst_114 = arith.constant dense<0xFF800000> : vector<8xf32>
    %245 = vector.multi_reduction <maximumf>, %244, %cst_114 [1] : vector<8x8xf32> to vector<8xf32>
    %246 = vector.shape_cast %245 : vector<8xf32> to vector<8x1xf32>
    %247 = vector.broadcast %246 : vector<8x1xf32> to vector<8x8xf32>
    %248 = arith.subf %244, %247 : vector<8x8xf32>
    %249 = math.exp %248 : vector<8x8xf32>
    %cst_115 = arith.constant dense<0.000000e+00> : vector<8xf32>
    %250 = vector.multi_reduction <add>, %249, %cst_115 [1] : vector<8x8xf32> to vector<8xf32>
    %251 = vector.shape_cast %250 : vector<8xf32> to vector<8x1xf32>
    %252 = tpu.reciprocal %251 {approx = true} : vector<8x1xf32> -> vector<8x1xf32>
    %253 = vector.broadcast %252 : vector<8x1xf32> to vector<8x8xf32>
    %254 = arith.mulf %249, %253 : vector<8x8xf32>
    %cst_116 = arith.constant dense<0.000000e+00> : vector<8x8xf32>
    %255 = tpu.matmul %254, %241, %cst_116 {dimension_numbers = #tpu.dot_dimension_numbers<[1], [0], [0], [1], [0, 0, 1, 1], [], []>} : vector<8x8xf32>, vector<8x8xf32>, vector<8x8xf32> -> vector<8x8xf32>
    %c0_117 = arith.constant 0 : index
    %c0_118 = arith.constant 0 : index
    %256 = vector.load %arg15[%c0_117, %c0_118] : memref<16x32xf32, #tpu.memory_space<vmem>>, vector<8x8xf32>
    tpu.vector_store %arg15[%c0_117, %c0_118], %255 {strides = array<i32>} : memref<16x32xf32, #tpu.memory_space<vmem>>, vector<8x8xf32>,
    %257 = vector.extract_strided_slice %236 {offsets = [0, 8], sizes = [8, 8], strides = [1, 1]} : vector<16x96xf32> to vector<8x8xf32>
    %258 = vector.extract_strided_slice %236 {offsets = [0, 40], sizes = [8, 8], strides = [1, 1]} : vector<16x96xf32> to vector<8x8xf32>
    %259 = vector.extract_strided_slice %236 {offsets = [0, 72], sizes = [8, 8], strides = [1, 1]} : vector<16x96xf32> to vector<8x8xf32>
    "tpu.trace_start"() <{level = 10 : i32, message = "qd,kd->qk"}> : () -> ()
    %cst_119 = arith.constant dense<0.000000e+00> : vector<8x8xf32>
    %260 = tpu.matmul %257, %258, %cst_119 {dimension_numbers = #tpu.dot_dimension_numbers<[1], [1], [0], [0], [0, 0, 1, 0], [], []>} : vector<8x8xf32>, vector<8x8xf32>, vector<8x8xf32> -> vector<8x8xf32>
    "tpu.trace_stop"() : () -> ()
    %261 = vector.broadcast %238 : vector<1x8xf32> to vector<8x8xf32>
    %262 = arith.addf %260, %261 : vector<8x8xf32>
    %cst_120 = arith.constant dense<0xFF800000> : vector<8xf32>
    %263 = vector.multi_reduction <maximumf>, %262, %cst_120 [1] : vector<8x8xf32> to vector<8xf32>
    %264 = vector.shape_cast %263 : vector<8xf32> to vector<8x1xf32>
    %265 = vector.broadcast %264 : vector<8x1xf32> to vector<8x8xf32>
    %266 = arith.subf %262, %265 : vector<8x8xf32>
    %267 = math.exp %266 : vector<8x8xf32>
    %cst_121 = arith.constant dense<0.000000e+00> : vector<8xf32>
    %268 = vector.multi_reduction <add>, %267, %cst_121 [1] : vector<8x8xf32> to vector<8xf32>
    %269 = vector.shape_cast %268 : vector<8xf32> to vector<8x1xf32>
    %270 = tpu.reciprocal %269 {approx = true} : vector<8x1xf32> -> vector<8x1xf32>
    %271 = vector.broadcast %270 : vector<8x1xf32> to vector<8x8xf32>
    %272 = arith.mulf %267, %271 : vector<8x8xf32>
    %cst_122 = arith.constant dense<0.000000e+00> : vector<8x8xf32>
    %273 = tpu.matmul %272, %259, %cst_122 {dimension_numbers = #tpu.dot_dimension_numbers<[1], [0], [0], [1], [0, 0, 1, 1], [], []>} : vector<8x8xf32>, vector<8x8xf32>, vector<8x8xf32> -> vector<8x8xf32>
    %c0_123 = arith.constant 0 : index
    %c8_124 = arith.constant 8 : index
    %274 = vector.load %arg15[%c0_123, %c8_124] : memref<16x32xf32, #tpu.memory_space<vmem>>, vector<8x8xf32>
    tpu.vector_store %arg15[%c0_123, %c8_124], %273 {strides = array<i32>} : memref<16x32xf32, #tpu.memory_space<vmem>>, vector<8x8xf32>,
    %275 = vector.extract_strided_slice %236 {offsets = [0, 16], sizes = [8, 8], strides = [1, 1]} : vector<16x96xf32> to vector<8x8xf32>
    %276 = vector.extract_strided_slice %236 {offsets = [0, 48], sizes = [8, 8], strides = [1, 1]} : vector<16x96xf32> to vector<8x8xf32>
    %277 = vector.extract_strided_slice %236 {offsets = [0, 80], sizes = [8, 8], strides = [1, 1]} : vector<16x96xf32> to vector<8x8xf32>
    "tpu.trace_start"() <{level = 10 : i32, message = "qd,kd->qk"}> : () -> ()
    %cst_125 = arith.constant dense<0.000000e+00> : vector<8x8xf32>
    %278 = tpu.matmul %275, %276, %cst_125 {dimension_numbers = #tpu.dot_dimension_numbers<[1], [1], [0], [0], [0, 0, 1, 0], [], []>} : vector<8x8xf32>, vector<8x8xf32>, vector<8x8xf32> -> vector<8x8xf32>
    "tpu.trace_stop"() : () -> ()
    %279 = vector.broadcast %238 : vector<1x8xf32> to vector<8x8xf32>
    %280 = arith.addf %278, %279 : vector<8x8xf32>
    %cst_126 = arith.constant dense<0xFF800000> : vector<8xf32>
    %281 = vector.multi_reduction <maximumf>, %280, %cst_126 [1] : vector<8x8xf32> to vector<8xf32>
    %282 = vector.shape_cast %281 : vector<8xf32> to vector<8x1xf32>
    %283 = vector.broadcast %282 : vector<8x1xf32> to vector<8x8xf32>
    %284 = arith.subf %280, %283 : vector<8x8xf32>
    %285 = math.exp %284 : vector<8x8xf32>
    %cst_127 = arith.constant dense<0.000000e+00> : vector<8xf32>
    %286 = vector.multi_reduction <add>, %285, %cst_127 [1] : vector<8x8xf32> to vector<8xf32>
    %287 = vector.shape_cast %286 : vector<8xf32> to vector<8x1xf32>
    %288 = tpu.reciprocal %287 {approx = true} : vector<8x1xf32> -> vector<8x1xf32>
    %289 = vector.broadcast %288 : vector<8x1xf32> to vector<8x8xf32>
    %290 = arith.mulf %285, %289 : vector<8x8xf32>
    %cst_128 = arith.constant dense<0.000000e+00> : vector<8x8xf32>
    %291 = tpu.matmul %290, %277, %cst_128 {dimension_numbers = #tpu.dot_dimension_numbers<[1], [0], [0], [1], [0, 0, 1, 1], [], []>} : vector<8x8xf32>, vector<8x8xf32>, vector<8x8xf32> -> vector<8x8xf32>
    %c0_129 = arith.constant 0 : index
    %c16_130 = arith.constant 16 : index
    %292 = vector.load %arg15[%c0_129, %c16_130] : memref<16x32xf32, #tpu.memory_space<vmem>>, vector<8x8xf32>
    tpu.vector_store %arg15[%c0_129, %c16_130], %291 {strides = array<i32>} : memref<16x32xf32, #tpu.memory_space<vmem>>, vector<8x8xf32>,
    %293 = vector.extract_strided_slice %236 {offsets = [0, 24], sizes = [8, 8], strides = [1, 1]} : vector<16x96xf32> to vector<8x8xf32>
    %294 = vector.extract_strided_slice %236 {offsets = [0, 56], sizes = [8, 8], strides = [1, 1]} : vector<16x96xf32> to vector<8x8xf32>
    %295 = vector.extract_strided_slice %236 {offsets = [0, 88], sizes = [8, 8], strides = [1, 1]} : vector<16x96xf32> to vector<8x8xf32>
    "tpu.trace_start"() <{level = 10 : i32, message = "qd,kd->qk"}> : () -> ()
    %cst_131 = arith.constant dense<0.000000e+00> : vector<8x8xf32>
    %296 = tpu.matmul %293, %294, %cst_131 {dimension_numbers = #tpu.dot_dimension_numbers<[1], [1], [0], [0], [0, 0, 1, 0], [], []>} : vector<8x8xf32>, vector<8x8xf32>, vector<8x8xf32> -> vector<8x8xf32>
    "tpu.trace_stop"() : () -> ()
    %297 = vector.broadcast %238 : vector<1x8xf32> to vector<8x8xf32>
    %298 = arith.addf %296, %297 : vector<8x8xf32>
    %cst_132 = arith.constant dense<0xFF800000> : vector<8xf32>
    %299 = vector.multi_reduction <maximumf>, %298, %cst_132 [1] : vector<8x8xf32> to vector<8xf32>
    %300 = vector.shape_cast %299 : vector<8xf32> to vector<8x1xf32>
    %301 = vector.broadcast %300 : vector<8x1xf32> to vector<8x8xf32>
    %302 = arith.subf %298, %301 : vector<8x8xf32>
    %303 = math.exp %302 : vector<8x8xf32>
    %cst_133 = arith.constant dense<0.000000e+00> : vector<8xf32>
    %304 = vector.multi_reduction <add>, %303, %cst_133 [1] : vector<8x8xf32> to vector<8xf32>
    %305 = vector.shape_cast %304 : vector<8xf32> to vector<8x1xf32>
    %306 = tpu.reciprocal %305 {approx = true} : vector<8x1xf32> -> vector<8x1xf32>
    %307 = vector.broadcast %306 : vector<8x1xf32> to vector<8x8xf32>
    %308 = arith.mulf %303, %307 : vector<8x8xf32>
    %cst_134 = arith.constant dense<0.000000e+00> : vector<8x8xf32>
    %309 = tpu.matmul %308, %295, %cst_134 {dimension_numbers = #tpu.dot_dimension_numbers<[1], [0], [0], [1], [0, 0, 1, 1], [], []>} : vector<8x8xf32>, vector<8x8xf32>, vector<8x8xf32> -> vector<8x8xf32>
    %c0_135 = arith.constant 0 : index
    %c24_136 = arith.constant 24 : index
    %310 = vector.load %arg15[%c0_135, %c24_136] : memref<16x32xf32, #tpu.memory_space<vmem>>, vector<8x8xf32>
    tpu.vector_store %arg15[%c0_135, %c24_136], %309 {strides = array<i32>} : memref<16x32xf32, #tpu.memory_space<vmem>>, vector<8x8xf32>,
    %c1_137 = arith.constant 1 : index
    %c0_138 = arith.constant 0 : index
    %c0_139 = arith.constant 0 : index
    %311 = vector.load %arg1[%c1_137, %c0_138, %c0_139] : memref<2x1x8xf32, #tpu.memory_space<vmem>>, vector<1x1x8xf32>
    %312 = vector.shape_cast %311 : vector<1x1x8xf32> to vector<1x8xf32>
    %313 = vector.extract_strided_slice %236 {offsets = [8, 0], sizes = [8, 8], strides = [1, 1]} : vector<16x96xf32> to vector<8x8xf32>
    %314 = vector.extract_strided_slice %236 {offsets = [8, 32], sizes = [8, 8], strides = [1, 1]} : vector<16x96xf32> to vector<8x8xf32>
    %315 = vector.extract_strided_slice %236 {offsets = [8, 64], sizes = [8, 8], strides = [1, 1]} : vector<16x96xf32> to vector<8x8xf32>
    "tpu.trace_start"() <{level = 10 : i32, message = "qd,kd->qk"}> : () -> ()
    %cst_140 = arith.constant dense<0.000000e+00> : vector<8x8xf32>
    %316 = tpu.matmul %313, %314, %cst_140 {dimension_numbers = #tpu.dot_dimension_numbers<[1], [1], [0], [0], [0, 0, 1, 0], [], []>} : vector<8x8xf32>, vector<8x8xf32>, vector<8x8xf32> -> vector<8x8xf32>
    "tpu.trace_stop"() : () -> ()
    %317 = vector.broadcast %312 : vector<1x8xf32> to vector<8x8xf32>
    %318 = arith.addf %316, %317 : vector<8x8xf32>
    %cst_141 = arith.constant dense<0xFF800000> : vector<8xf32>
    %319 = vector.multi_reduction <maximumf>, %318, %cst_141 [1] : vector<8x8xf32> to vector<8xf32>
    %320 = vector.shape_cast %319 : vector<8xf32> to vector<8x1xf32>
    %321 = vector.broadcast %320 : vector<8x1xf32> to vector<8x8xf32>
    %322 = arith.subf %318, %321 : vector<8x8xf32>
    %323 = math.exp %322 : vector<8x8xf32>
    %cst_142 = arith.constant dense<0.000000e+00> : vector<8xf32>
    %324 = vector.multi_reduction <add>, %323, %cst_142 [1] : vector<8x8xf32> to vector<8xf32>
    %325 = vector.shape_cast %324 : vector<8xf32> to vector<8x1xf32>
    %326 = tpu.reciprocal %325 {approx = true} : vector<8x1xf32> -> vector<8x1xf32>
    %327 = vector.broadcast %326 : vector<8x1xf32> to vector<8x8xf32>
    %328 = arith.mulf %323, %327 : vector<8x8xf32>
    %cst_143 = arith.constant dense<0.000000e+00> : vector<8x8xf32>
    %329 = tpu.matmul %328, %315, %cst_143 {dimension_numbers = #tpu.dot_dimension_numbers<[1], [0], [0], [1], [0, 0, 1, 1], [], []>} : vector<8x8xf32>, vector<8x8xf32>, vector<8x8xf32> -> vector<8x8xf32>
    %c8_144 = arith.constant 8 : index
    %c0_145 = arith.constant 0 : index
    %330 = vector.load %arg15[%c8_144, %c0_145] : memref<16x32xf32, #tpu.memory_space<vmem>>, vector<8x8xf32>
    tpu.vector_store %arg15[%c8_144, %c0_145], %329 {strides = array<i32>} : memref<16x32xf32, #tpu.memory_space<vmem>>, vector<8x8xf32>,
    %331 = vector.extract_strided_slice %236 {offsets = [8, 8], sizes = [8, 8], strides = [1, 1]} : vector<16x96xf32> to vector<8x8xf32>
    %332 = vector.extract_strided_slice %236 {offsets = [8, 40], sizes = [8, 8], strides = [1, 1]} : vector<16x96xf32> to vector<8x8xf32>
    %333 = vector.extract_strided_slice %236 {offsets = [8, 72], sizes = [8, 8], strides = [1, 1]} : vector<16x96xf32> to vector<8x8xf32>
    "tpu.trace_start"() <{level = 10 : i32, message = "qd,kd->qk"}> : () -> ()
    %cst_146 = arith.constant dense<0.000000e+00> : vector<8x8xf32>
    %334 = tpu.matmul %331, %332, %cst_146 {dimension_numbers = #tpu.dot_dimension_numbers<[1], [1], [0], [0], [0, 0, 1, 0], [], []>} : vector<8x8xf32>, vector<8x8xf32>, vector<8x8xf32> -> vector<8x8xf32>
    "tpu.trace_stop"() : () -> ()
    %335 = vector.broadcast %312 : vector<1x8xf32> to vector<8x8xf32>
    %336 = arith.addf %334, %335 : vector<8x8xf32>
    %cst_147 = arith.constant dense<0xFF800000> : vector<8xf32>
    %337 = vector.multi_reduction <maximumf>, %336, %cst_147 [1] : vector<8x8xf32> to vector<8xf32>
    %338 = vector.shape_cast %337 : vector<8xf32> to vector<8x1xf32>
    %339 = vector.broadcast %338 : vector<8x1xf32> to vector<8x8xf32>
    %340 = arith.subf %336, %339 : vector<8x8xf32>
    %341 = math.exp %340 : vector<8x8xf32>
    %cst_148 = arith.constant dense<0.000000e+00> : vector<8xf32>
    %342 = vector.multi_reduction <add>, %341, %cst_148 [1] : vector<8x8xf32> to vector<8xf32>
    %343 = vector.shape_cast %342 : vector<8xf32> to vector<8x1xf32>
    %344 = tpu.reciprocal %343 {approx = true} : vector<8x1xf32> -> vector<8x1xf32>
    %345 = vector.broadcast %344 : vector<8x1xf32> to vector<8x8xf32>
    %346 = arith.mulf %341, %345 : vector<8x8xf32>
    %cst_149 = arith.constant dense<0.000000e+00> : vector<8x8xf32>
    %347 = tpu.matmul %346, %333, %cst_149 {dimension_numbers = #tpu.dot_dimension_numbers<[1], [0], [0], [1], [0, 0, 1, 1], [], []>} : vector<8x8xf32>, vector<8x8xf32>, vector<8x8xf32> -> vector<8x8xf32>
    %c8_150 = arith.constant 8 : index
    %c8_151 = arith.constant 8 : index
    %348 = vector.load %arg15[%c8_150, %c8_151] : memref<16x32xf32, #tpu.memory_space<vmem>>, vector<8x8xf32>
    tpu.vector_store %arg15[%c8_150, %c8_151], %347 {strides = array<i32>} : memref<16x32xf32, #tpu.memory_space<vmem>>, vector<8x8xf32>,
    %349 = vector.extract_strided_slice %236 {offsets = [8, 16], sizes = [8, 8], strides = [1, 1]} : vector<16x96xf32> to vector<8x8xf32>
    %350 = vector.extract_strided_slice %236 {offsets = [8, 48], sizes = [8, 8], strides = [1, 1]} : vector<16x96xf32> to vector<8x8xf32>
    %351 = vector.extract_strided_slice %236 {offsets = [8, 80], sizes = [8, 8], strides = [1, 1]} : vector<16x96xf32> to vector<8x8xf32>
    "tpu.trace_start"() <{level = 10 : i32, message = "qd,kd->qk"}> : () -> ()
    %cst_152 = arith.constant dense<0.000000e+00> : vector<8x8xf32>
    %352 = tpu.matmul %349, %350, %cst_152 {dimension_numbers = #tpu.dot_dimension_numbers<[1], [1], [0], [0], [0, 0, 1, 0], [], []>} : vector<8x8xf32>, vector<8x8xf32>, vector<8x8xf32> -> vector<8x8xf32>
    "tpu.trace_stop"() : () -> ()
    %353 = vector.broadcast %312 : vector<1x8xf32> to vector<8x8xf32>
    %354 = arith.addf %352, %353 : vector<8x8xf32>
    %cst_153 = arith.constant dense<0xFF800000> : vector<8xf32>
    %355 = vector.multi_reduction <maximumf>, %354, %cst_153 [1] : vector<8x8xf32> to vector<8xf32>
    %356 = vector.shape_cast %355 : vector<8xf32> to vector<8x1xf32>
    %357 = vector.broadcast %356 : vector<8x1xf32> to vector<8x8xf32>
    %358 = arith.subf %354, %357 : vector<8x8xf32>
    %359 = math.exp %358 : vector<8x8xf32>
    %cst_154 = arith.constant dense<0.000000e+00> : vector<8xf32>
    %360 = vector.multi_reduction <add>, %359, %cst_154 [1] : vector<8x8xf32> to vector<8xf32>
    %361 = vector.shape_cast %360 : vector<8xf32> to vector<8x1xf32>
    %362 = tpu.reciprocal %361 {approx = true} : vector<8x1xf32> -> vector<8x1xf32>
    %363 = vector.broadcast %362 : vector<8x1xf32> to vector<8x8xf32>
    %364 = arith.mulf %359, %363 : vector<8x8xf32>
    %cst_155 = arith.constant dense<0.000000e+00> : vector<8x8xf32>
    %365 = tpu.matmul %364, %351, %cst_155 {dimension_numbers = #tpu.dot_dimension_numbers<[1], [0], [0], [1], [0, 0, 1, 1], [], []>} : vector<8x8xf32>, vector<8x8xf32>, vector<8x8xf32> -> vector<8x8xf32>
    %c8_156 = arith.constant 8 : index
    %c16_157 = arith.constant 16 : index
    %366 = vector.load %arg15[%c8_156, %c16_157] : memref<16x32xf32, #tpu.memory_space<vmem>>, vector<8x8xf32>
    tpu.vector_store %arg15[%c8_156, %c16_157], %365 {strides = array<i32>} : memref<16x32xf32, #tpu.memory_space<vmem>>, vector<8x8xf32>,
    %367 = vector.extract_strided_slice %236 {offsets = [8, 24], sizes = [8, 8], strides = [1, 1]} : vector<16x96xf32> to vector<8x8xf32>
    %368 = vector.extract_strided_slice %236 {offsets = [8, 56], sizes = [8, 8], strides = [1, 1]} : vector<16x96xf32> to vector<8x8xf32>
    %369 = vector.extract_strided_slice %236 {offsets = [8, 88], sizes = [8, 8], strides = [1, 1]} : vector<16x96xf32> to vector<8x8xf32>
    "tpu.trace_start"() <{level = 10 : i32, message = "qd,kd->qk"}> : () -> ()
    %cst_158 = arith.constant dense<0.000000e+00> : vector<8x8xf32>
    %370 = tpu.matmul %367, %368, %cst_158 {dimension_numbers = #tpu.dot_dimension_numbers<[1], [1], [0], [0], [0, 0, 1, 0], [], []>} : vector<8x8xf32>, vector<8x8xf32>, vector<8x8xf32> -> vector<8x8xf32>
    "tpu.trace_stop"() : () -> ()
    %371 = vector.broadcast %312 : vector<1x8xf32> to vector<8x8xf32>
    %372 = arith.addf %370, %371 : vector<8x8xf32>
    %cst_159 = arith.constant dense<0xFF800000> : vector<8xf32>
    %373 = vector.multi_reduction <maximumf>, %372, %cst_159 [1] : vector<8x8xf32> to vector<8xf32>
    %374 = vector.shape_cast %373 : vector<8xf32> to vector<8x1xf32>
    %375 = vector.broadcast %374 : vector<8x1xf32> to vector<8x8xf32>
    %376 = arith.subf %372, %375 : vector<8x8xf32>
    %377 = math.exp %376 : vector<8x8xf32>
    %cst_160 = arith.constant dense<0.000000e+00> : vector<8xf32>
    %378 = vector.multi_reduction <add>, %377, %cst_160 [1] : vector<8x8xf32> to vector<8xf32>
    %379 = vector.shape_cast %378 : vector<8xf32> to vector<8x1xf32>
    %380 = tpu.reciprocal %379 {approx = true} : vector<8x1xf32> -> vector<8x1xf32>
    %381 = vector.broadcast %380 : vector<8x1xf32> to vector<8x8xf32>
    %382 = arith.mulf %377, %381 : vector<8x8xf32>
    %cst_161 = arith.constant dense<0.000000e+00> : vector<8x8xf32>
    %383 = tpu.matmul %382, %369, %cst_161 {dimension_numbers = #tpu.dot_dimension_numbers<[1], [0], [0], [1], [0, 0, 1, 1], [], []>} : vector<8x8xf32>, vector<8x8xf32>, vector<8x8xf32> -> vector<8x8xf32>
    %c8_162 = arith.constant 8 : index
    %c24_163 = arith.constant 24 : index
    %384 = vector.load %arg15[%c8_162, %c24_163] : memref<16x32xf32, #tpu.memory_space<vmem>>, vector<8x8xf32>
    tpu.vector_store %arg15[%c8_162, %c24_163], %383 {strides = array<i32>} : memref<16x32xf32, #tpu.memory_space<vmem>>, vector<8x8xf32>,
    %c0_164 = arith.constant 0 : index
    %c0_165 = arith.constant 0 : index
    %385 = vector.load %arg15[%c0_164, %c0_165] : memref<16x32xf32, #tpu.memory_space<vmem>>, vector<16x32xf32>
    %c1_166 = arith.constant 1 : index
    %c0_167 = arith.constant 0 : index
    %c0_168 = arith.constant 0 : index
    %386 = vector.load %arg4[%c1_166, %c0_167, %c0_168] : memref<2x32x32xf32, #tpu.memory_space<vmem>>, vector<1x32x32xf32>
    %387 = vector.shape_cast %386 : vector<1x32x32xf32> to vector<32x32xf32>
    %cst_169 = arith.constant dense<0.000000e+00> : vector<16x32xf32>
    %388 = tpu.matmul %385, %387, %cst_169 {dimension_numbers = #tpu.dot_dimension_numbers<[1], [0], [0], [1], [0, 0, 1, 1], [], []>} : vector<16x32xf32>, vector<32x32xf32>, vector<16x32xf32> -> vector<16x32xf32>
    %c1_170 = arith.constant 1 : index
    %c0_171 = arith.constant 0 : index
    %c0_172 = arith.constant 0 : index
    %389 = vector.load %arg5[%c1_170, %c0_171, %c0_172] : memref<2x1x32xf32, #tpu.memory_space<vmem>>, vector<1x1x32xf32>
    %390 = vector.shape_cast %389 : vector<1x1x32xf32> to vector<1x32xf32>
    %391 = vector.broadcast %390 : vector<1x32xf32> to vector<16x32xf32>
    %392 = arith.addf %388, %391 : vector<16x32xf32>
    %393 = arith.addf %229, %392 : vector<16x32xf32>
    %cst_173 = arith.constant dense<0.000000e+00> : vector<16xf32>
    %394 = vector.multi_reduction <add>, %393, %cst_173 [1] : vector<16x32xf32> to vector<16xf32>
    %395 = vector.shape_cast %394 : vector<16xf32> to vector<16x1xf32>
    %cst_174 = arith.constant 3.200000e+01 : f32
    %396 = vector.broadcast %cst_174 : f32 to vector<16x1xf32>
    %397 = arith.divf %395, %396 : vector<16x1xf32>
    %398 = vector.broadcast %397 : vector<16x1xf32> to vector<16x32xf32>
    %399 = arith.subf %393, %398 : vector<16x32xf32>
    %400 = arith.mulf %399, %399 : vector<16x32xf32>
    %cst_175 = arith.constant dense<0.000000e+00> : vector<16xf32>
    %401 = vector.multi_reduction <add>, %400, %cst_175 [1] : vector<16x32xf32> to vector<16xf32>
    %402 = vector.shape_cast %401 : vector<16xf32> to vector<16x1xf32>
    %cst_176 = arith.constant 3.200000e+01 : f32
    %403 = vector.broadcast %cst_176 : f32 to vector<16x1xf32>
    %404 = arith.divf %402, %403 : vector<16x1xf32>
    %cst_177 = arith.constant 9.99999974E-6 : f32
    %405 = vector.broadcast %cst_177 : f32 to vector<16x1xf32>
    %406 = arith.addf %404, %405 : vector<16x1xf32>
    %407 = math.rsqrt %406 : vector<16x1xf32>
    %408 = vector.broadcast %407 : vector<16x1xf32> to vector<16x32xf32>
    %409 = arith.mulf %399, %408 : vector<16x32xf32>
    %c1_178 = arith.constant 1 : index
    %c0_179 = arith.constant 0 : index
    %c0_180 = arith.constant 0 : index
    %410 = vector.load %arg6[%c1_178, %c0_179, %c0_180] : memref<2x1x32xf32, #tpu.memory_space<vmem>>, vector<1x1x32xf32>
    %411 = vector.shape_cast %410 : vector<1x1x32xf32> to vector<1x32xf32>
    %412 = vector.broadcast %411 : vector<1x32xf32> to vector<16x32xf32>
    %413 = arith.mulf %409, %412 : vector<16x32xf32>
    %c1_181 = arith.constant 1 : index
    %c0_182 = arith.constant 0 : index
    %c0_183 = arith.constant 0 : index
    %414 = vector.load %arg7[%c1_181, %c0_182, %c0_183] : memref<2x1x32xf32, #tpu.memory_space<vmem>>, vector<1x1x32xf32>
    %415 = vector.shape_cast %414 : vector<1x1x32xf32> to vector<1x32xf32>
    %416 = vector.broadcast %415 : vector<1x32xf32> to vector<16x32xf32>
    %417 = arith.addf %413, %416 : vector<16x32xf32>
    %c1_184 = arith.constant 1 : index
    %c0_185 = arith.constant 0 : index
    %c0_186 = arith.constant 0 : index
    %418 = vector.load %arg8[%c1_184, %c0_185, %c0_186] : memref<2x32x64xf32, #tpu.memory_space<vmem>>, vector<1x32x64xf32>
    %419 = vector.shape_cast %418 : vector<1x32x64xf32> to vector<32x64xf32>
    %cst_187 = arith.constant dense<0.000000e+00> : vector<16x64xf32>
    %420 = tpu.matmul %417, %419, %cst_187 {dimension_numbers = #tpu.dot_dimension_numbers<[1], [0], [0], [1], [0, 0, 1, 1], [], []>} : vector<16x32xf32>, vector<32x64xf32>, vector<16x64xf32> -> vector<16x64xf32>
    %c1_188 = arith.constant 1 : index
    %c0_189 = arith.constant 0 : index
    %c0_190 = arith.constant 0 : index
    %421 = vector.load %arg9[%c1_188, %c0_189, %c0_190] : memref<2x1x64xf32, #tpu.memory_space<vmem>>, vector<1x1x64xf32>
    %422 = vector.shape_cast %421 : vector<1x1x64xf32> to vector<1x64xf32>
    %423 = vector.broadcast %422 : vector<1x64xf32> to vector<16x64xf32>
    %424 = arith.addf %420, %423 : vector<16x64xf32>
    %cst_191 = arith.constant 0.000000e+00 : f32
    %425 = vector.broadcast %cst_191 : f32 to vector<16x64xf32>
    %426 = arith.maximumf %424, %425 : vector<16x64xf32>
    %c1_192 = arith.constant 1 : index
    %c0_193 = arith.constant 0 : index
    %c0_194 = arith.constant 0 : index
    %427 = vector.load %arg10[%c1_192, %c0_193, %c0_194] : memref<2x64x32xf32, #tpu.memory_space<vmem>>, vector<1x64x32xf32>
    %428 = vector.shape_cast %427 : vector<1x64x32xf32> to vector<64x32xf32>
    %cst_195 = arith.constant dense<0.000000e+00> : vector<16x32xf32>
    %429 = tpu.matmul %426, %428, %cst_195 {dimension_numbers = #tpu.dot_dimension_numbers<[1], [0], [0], [1], [0, 0, 1, 1], [], []>} : vector<16x64xf32>, vector<64x32xf32>, vector<16x32xf32> -> vector<16x32xf32>
    %c1_196 = arith.constant 1 : index
    %c0_197 = arith.constant 0 : index
    %c0_198 = arith.constant 0 : index
    %430 = vector.load %arg11[%c1_196, %c0_197, %c0_198] : memref<2x1x32xf32, #tpu.memory_space<vmem>>, vector<1x1x32xf32>
    %431 = vector.shape_cast %430 : vector<1x1x32xf32> to vector<1x32xf32>
    %432 = vector.broadcast %431 : vector<1x32xf32> to vector<16x32xf32>
    %433 = arith.addf %429, %432 : vector<16x32xf32>
    %434 = arith.addf %417, %433 : vector<16x32xf32>
    %cst_199 = arith.constant dense<0.000000e+00> : vector<16xf32>
    %435 = vector.multi_reduction <add>, %434, %cst_199 [1] : vector<16x32xf32> to vector<16xf32>
    %436 = vector.shape_cast %435 : vector<16xf32> to vector<16x1xf32>
    %cst_200 = arith.constant 3.200000e+01 : f32
    %437 = vector.broadcast %cst_200 : f32 to vector<16x1xf32>
    %438 = arith.divf %436, %437 : vector<16x1xf32>
    %439 = vector.broadcast %438 : vector<16x1xf32> to vector<16x32xf32>
    %440 = arith.subf %434, %439 : vector<16x32xf32>
    %441 = arith.mulf %440, %440 : vector<16x32xf32>
    %cst_201 = arith.constant dense<0.000000e+00> : vector<16xf32>
    %442 = vector.multi_reduction <add>, %441, %cst_201 [1] : vector<16x32xf32> to vector<16xf32>
    %443 = vector.shape_cast %442 : vector<16xf32> to vector<16x1xf32>
    %cst_202 = arith.constant 3.200000e+01 : f32
    %444 = vector.broadcast %cst_202 : f32 to vector<16x1xf32>
    %445 = arith.divf %443, %444 : vector<16x1xf32>
    %cst_203 = arith.constant 9.99999974E-6 : f32
    %446 = vector.broadcast %cst_203 : f32 to vector<16x1xf32>
    %447 = arith.addf %445, %446 : vector<16x1xf32>
    %448 = math.rsqrt %447 : vector<16x1xf32>
    %449 = vector.broadcast %448 : vector<16x1xf32> to vector<16x32xf32>
    %450 = arith.mulf %440, %449 : vector<16x32xf32>
    %c1_204 = arith.constant 1 : index
    %c0_205 = arith.constant 0 : index
    %c0_206 = arith.constant 0 : index
    %451 = vector.load %arg12[%c1_204, %c0_205, %c0_206] : memref<2x1x32xf32, #tpu.memory_space<vmem>>, vector<1x1x32xf32>
    %452 = vector.shape_cast %451 : vector<1x1x32xf32> to vector<1x32xf32>
    %453 = vector.broadcast %452 : vector<1x32xf32> to vector<16x32xf32>
    %454 = arith.mulf %450, %453 : vector<16x32xf32>
    %c1_207 = arith.constant 1 : index
    %c0_208 = arith.constant 0 : index
    %c0_209 = arith.constant 0 : index
    %455 = vector.load %arg13[%c1_207, %c0_208, %c0_209] : memref<2x1x32xf32, #tpu.memory_space<vmem>>, vector<1x1x32xf32>
    %456 = vector.shape_cast %455 : vector<1x1x32xf32> to vector<1x32xf32>
    %457 = vector.broadcast %456 : vector<1x32xf32> to vector<16x32xf32>
    %458 = arith.addf %454, %457 : vector<16x32xf32>
    %c0_210 = arith.constant 0 : index
    %c0_211 = arith.constant 0 : index
    %459 = vector.load %arg14[%c0_210, %c0_211] : memref<16x32xf32, #tpu.memory_space<vmem>>, vector<16x32xf32>
    tpu.vector_store %arg14[%c0_210, %c0_211], %458 {strides = array<i32>} : memref<16x32xf32, #tpu.memory_space<vmem>>, vector<16x32xf32>,
    return
  }
}

</mosaic_0001>

<bundles_post_ra>
// kernel: transformer_encoder_forward.1
= control target key start
LH: loop header
LB: loop body
LE: loop exit
PB: predicated region body
PF: predicated region fallthrough
CT: control target
= control target key end

     0   :  { %vm60_vm0 = vcmask 261120   ;;  %v4413_v8 = vmov 0.0   ;;  %vm4414_vm1 = vmmov 0   ;;  %s4416_s27 = smov 96   ;;  %s4417_s28 = smov 80   ;;  %vm152_vm2 = vcmask 64512   ;;  %s5102_s2 = inlined_call_operand.vmem [shape: f32[2,32,96], index: 2, kind: input, shape index: {}]   ;;  %s5103_s0 = inlined_call_operand.vmem [shape: f32[16,32], index: 0, kind: input, shape index: {}]   ;;  %s5104_s3 = inlined_call_operand.vmem [shape: f32[2,1,96], index: 3, kind: input, shape index: {}]   ;;  %s5105_s1 = inlined_call_operand.vmem [shape: f32[2,1,8], index: 1, kind: input, shape index: {}]   ;;  %s5106_s4 = inlined_call_operand.vmem [shape: f32[2,32,32], index: 4, kind: input, shape index: {}]   ;;  %s5107_s5 = inlined_call_operand.vmem [shape: f32[2,1,32], index: 5, kind: input, shape index: {}]   ;;  %s5108_s8 = inlined_call_operand.vmem [shape: f32[2,32,64], index: 8, kind: input, shape index: {}]   ;;  %s5109_s10 = inlined_call_operand.vmem [shape: f32[2,64,32], index: 10, kind: input, shape index: {}]   ;;  %s5110_s6 = inlined_call_operand.vmem [shape: f32[2,1,32], index: 6, kind: input, shape index: {}]   ;;  %s5111_s7 = inlined_call_operand.vmem [shape: f32[2,1,32], index: 7, kind: input, shape index: {}]   ;;  %s5112_s9 = inlined_call_operand.vmem [shape: f32[2,1,64], index: 9, kind: input, shape index: {}]   ;;  %s5113_s11 = inlined_call_operand.vmem [shape: f32[2,1,32], index: 11, kind: input, shape index: {}]   ;;  %s5114_s12 = inlined_call_operand.vmem [shape: f32[2,1,32], index: 12, kind: input, shape index: {}]   ;;  %s5115_s13 = inlined_call_operand.vmem [shape: f32[2,1,32], index: 13, kind: input, shape index: {}]   ;;  %s5116_s14 = inlined_call_operand.vmem [shape: f32[16,32], index: 14, kind: output, shape index: {}]  }
   0x1   :  { %v49_v0 = vld [vmem:[%s5102_s2] sm:$0xff]  ;;  %v50_v1 = vld [vmem:[%s5102_s2 + $0x8] sm:$0xff]  ;;  %v51_v2 = vld [vmem:[%s5102_s2 + $0x10] sm:$0xff]  ;;  %3994 = vmatprep.subr.mxu0 %v4413_v8  ;;  %3996 = vmatprep.mubr.msk.f32.mxu0 %vm4414_vm1, %v4413_v8  ;;  %s4418_s29 = smov 88   ;;  %s4419_s30 = smov 72   ;;  %vm484_vm3 = vcmask 130112  }
   0x2   :  { %v4237_v3 = vpack.c.bf16 %v50_v1, %v49_v0  ;;  %v52_v4 = vld [vmem:[%s5102_s2 + $0x18] sm:$0xff]  ;;  %v4519_v5 = vld [vmem:[%s5103_s0] sm:$0xff]  ;;  %v4526_v7 = vld [vmem:[%s5103_s0 + $0x8] sm:$0xff]  ;;  %s4415_s0 = smov 120   ;;  %s4420_s15 = smov 112   ;;  %vm655_vm4 = vcmask 195712  }
   0x3   :  { %v4241_v6 = vpack.c.bf16 %v52_v4, %v51_v2  ;;  %3981 = vmatprep.mubr.msk.f32.mxu1 %vm60_vm0, %v4519_v5  ;;  %v3739_v9 = vld [vmem:[%s5104_s3] ss:$0 sm:$0xff]  ;;  %s4421_s16 = smov 104   ;;  %s5121_s17 = smov 56   ;;  %v4630_v45 = vld [vmem:[%s5105_s1 + $0x1] ss:$0 sm:$0xff] }
   0x4   :  { %4238 = vmatprep.subr.bf16.mxu1 %v4237_v3  ;;  %s5123_s18 = smov 64   ;;  %v4618_v29 = vld [vmem:[%s5105_s1] ss:$0 sm:$0xff]  ;;  %s5119_s1 = smov 40   ;;  %vm826_vm5 = vcmask 261312   ;;  %vm1761_vm6 = vcmask 523264  }
   0x5   :  { %4240 = vmatpush3.bf16.msra.mxu1 %v4237_v3  ;;  %s5117_s23 = smov 48   ;;  %s4426_s24 = smov 8  }
   0x6   :  { %4242 = vmatprep.subr.bf16.mxu1 %v4241_v6  ;;  %s5127_s25 = smov 16   ;;  %s5125_s26 = smov 24  }
   0x9   :  { %4244 = vmatpush3.bf16.msra.mxu1 %v4241_v6 }
   0xa   :  { %3984 = vmatprep.subr.mxu1 %v4413_v8 }
   0xc   :  { %3982 = vmatmul.mubr.msk.f32.vlgmr.msra.gmra.mrb[0].mxu1 %vm60_vm0, %v4526_v7 }
   0xd   :  { %3986 = vmatprep.mubr.msk.f32.mxu1 %vm4414_vm1, %v4413_v8 }
  0xdf   :  { %v3983_v10 = vpop.f32.mrb[0].mxu1 }
  0xe0   :  { %v133_v11 = vpop.f32.mrb[1].mxu1  ;;  %v4553_v13 = vadd.f32 %v3983_v10, %v3739_v9 }
  0xe1   :  { %v4539_v12 = vadd.f32 %v3739_v9, %v133_v11 }
  0xe3   :  { %315 = vrot.lane.b32.xlu1 %v4539_v12, %s4415_s0  ;;  %150 = vrot.lane.b32.xlu0 %v4539_v12, %s4416_s27 }
  0xe7   :  { %488 = vrot.lane.b32.xlu1 %v4539_v12, %s4417_s28  ;;  %317 = vrot.lane.b32.xlu0 %v4539_v12, %s4418_s29 }
  0xeb   :  { %659 = vrot.lane.b32.xlu1 %v4539_v12, %s4419_s30  ;;  %486 = vrot.lane.b32.xlu0 %v4539_v12, %s4420_s15 }
  0xef   :  { %837 = vrot.lane.b32.xlu1 %v4553_v13, %s4416_s27  ;;  %657 = vrot.lane.b32.xlu0 %v4539_v12, %s4421_s16 }
  0xf3   :  { %1001 = vrot.lane.b32.xlu1 %v4553_v13, %s4415_s0  ;;  %1003 = vrot.lane.b32.xlu0 %v4553_v13, %s4418_s29 }
  0xf7   :  { %1171 = vrot.lane.b32.xlu1 %v4553_v13, %s4420_s15  ;;  %1173 = vrot.lane.b32.xlu0 %v4553_v13, %s4417_s28 }
  0xfb   :  { %1341 = vrot.lane.b32.xlu1 %v4553_v13, %s4421_s16  ;;  %1343 = vrot.lane.b32.xlu0 %v4553_v13, %s4419_s30 }
  0xff   :  { %404 = vrot.lane.b32.xlu1 %v4539_v12, %s5121_s17  ;;  %238 = vrot.lane.b32.xlu0 %v4539_v12, %s5123_s18 }
 0x155   :  { %v316_v14 = vpop.permute.xlu1 %315  ;;  %v151_v15 = vpop.permute.xlu0 %150 }
 0x156   :  { %3985 = vmatpush3.xpose.msk.msra.mxu1 %vm152_vm2, %v151_v15 }
 0x157   :  { %3989 = vmatprep.subr.mxu1 %v4413_v8 }
 0x159   :  { %v489_v16 = vpop.permute.xlu1 %488  ;;  %3987 = vmatmul.mubr.msk.f32.vlgmr.msra.gmra.mrb[2].mxu1 %vm152_vm2, %v4539_v12  ;;  %v318_v17 = vpop.permute.xlu0 %317 }
 0x15a   :  { %3995 = vmatpush3.xpose.msk.msra.mxu0 %vm152_vm2, %v318_v17  ;;  %3991 = vmatprep.mubr.msk.f32.mxu1 %vm4414_vm1, %v4413_v8 }
 0x15b   :  { %4004 = vmatprep.subr.mxu0 %v4413_v8 }
 0x15d   :  { %v660_v18 = vpop.permute.xlu1 %659  ;;  %3997 = vmatmul.mubr.msk.f32.vlgmr.msra.gmra.mrb[0].mxu0 %vm152_vm2, %v316_v14  ;;  %v487_v19 = vpop.permute.xlu0 %486 }
 0x15e   :  { %4005 = vmatpush3.xpose.msk.msra.mxu0 %vm152_vm2, %v489_v16  ;;  %4006 = vmatprep.mubr.msk.f32.mxu0 %vm4414_vm1, %v4413_v8 }
 0x15f   :  { %4014 = vmatprep.subr.mxu0 %v4413_v8 }
 0x161   :  { %4007 = vmatmul.mubr.msk.f32.vlgmr.msra.gmra.mrb[2].mxu0 %vm152_vm2, %v487_v19  ;;  %v658_v20 = vpop.permute.xlu0 %657  ;;  %v838_v21 = vpop.permute.xlu1 %837 }
 0x162   :  { %4015 = vmatpush3.xpose.msk.msra.mxu0 %vm152_vm2, %v660_v18  ;;  %4016 = vmatprep.mubr.msk.f32.mxu0 %vm4414_vm1, %v4413_v8 }
 0x163   :  { %4024 = vmatprep.subr.mxu0 %v4413_v8 }
 0x165   :  { %4017 = vmatmul.mubr.msk.f32.vlgmr.msra.gmra.mrb[4].mxu0 %vm152_vm2, %v658_v20  ;;  %v1004_v22 = vpop.permute.xlu0 %1003  ;;  %v1002_v23 = vpop.permute.xlu1 %1001 }
 0x166   :  { %4025 = vmatpush3.xpose.msk.msra.mxu0 %vm152_vm2, %v838_v21  ;;  %4026 = vmatprep.mubr.msk.f32.mxu0 %vm4414_vm1, %v4413_v8 }
 0x167   :  { %4034 = vmatprep.subr.mxu0 %v4413_v8 }
 0x169   :  { %4027 = vmatmul.mubr.msk.f32.vlgmr.msra.gmra.mrb[6].mxu0 %vm152_vm2, %v4553_v13  ;;  %v1174_v24 = vpop.permute.xlu0 %1173  ;;  %v1172_v26 = vpop.permute.xlu1 %1171 }
 0x16a   :  { %4035 = vmatpush3.xpose.msk.msra.mxu0 %vm152_vm2, %v1004_v22  ;;  %4036 = vmatprep.mubr.msk.f32.mxu0 %vm4414_vm1, %v4413_v8 }
 0x16b   :  { %4044 = vmatprep.subr.mxu0 %v4413_v8 }
 0x16d   :  { %4037 = vmatmul.mubr.msk.f32.vlgmr.msra.gmra.mrb[8].mxu0 %vm152_vm2, %v1002_v23  ;;  %v1344_v25 = vpop.permute.xlu0 %1343  ;;  %v1342_v28 = vpop.permute.xlu1 %1341 }
 0x16e   :  { %4045 = vmatpush3.xpose.msk.msra.mxu0 %vm152_vm2, %v1174_v24  ;;  %4046 = vmatprep.mubr.msk.f32.mxu0 %vm4414_vm1, %v4413_v8 }
 0x16f   :  { %4054 = vmatprep.subr.mxu0 %v4413_v8 }
 0x171   :  { %4047 = vmatmul.mubr.msk.f32.vlgmr.msra.gmra.mrb[10].mxu0 %vm152_vm2, %v1172_v26  ;;  %v239_v27 = vpop.permute.xlu0 %238  ;;  %v4645_v63 = vpop.permute.xlu1 %404 }
 0x172   :  { %3990 = vmatpush3.msra.mxu1 %v239_v27  ;;  %4055 = vmatpush3.xpose.msk.msra.mxu0 %vm152_vm2, %v1344_v25 }
 0x173   :  { %4056 = vmatprep.mubr.msk.f32.mxu0 %vm4414_vm1, %v4413_v8  ;;  %3999 = vmatprep.subr.mxu1 %v4413_v8 }
 0x175   :  { %4057 = vmatmul.mubr.msk.f32.vlgmr.msra.gmra.mrb[12].mxu0 %vm152_vm2, %v1342_v28 }
 0x22c   :  { %v223_v30 = vpop.f32.mrb[2].mxu1 }
 0x22d   :  { %v224_v31 = vadd.f32 %v4618_v29, %v223_v30  ;;  %v3988_v32 = vpop.f32.mrb[3].mxu1 }
 0x22f   :  { %v227_v33 = vsel %vm152_vm2, %v224_v31, -inf }
 0x230   :  { %228 = vmax.xlane.f32.xlu0 %v227_v33  ;;  %v389_v34 = vpop.f32.mrb[0].mxu0 }
 0x231   :  { %v390_v35 = vadd.f32 %v4618_v29, %v389_v34  ;;  %v3998_v36 = vpop.f32.mrb[1].mxu0 }
 0x233   :  { %v393_v37 = vsel %vm152_vm2, %v390_v35, -inf }
 0x234   :  { %394 = vmax.xlane.f32.xlu1 %v393_v37  ;;  %v560_v38 = vpop.f32.mrb[2].mxu0 }
 0x235   :  { %v561_v39 = vadd.f32 %v4618_v29, %v560_v38  ;;  %v4008_v40 = vpop.f32.mrb[3].mxu0 }
 0x237   :  { %v564_v41 = vsel %vm152_vm2, %v561_v39, -inf }
 0x238   :  { %565 = vmax.xlane.f32.xlu0 %v564_v41  ;;  %v731_v42 = vpop.f32.mrb[4].mxu0 }
 0x239   :  { %v732_v43 = vadd.f32 %v4618_v29, %v731_v42  ;;  %v4018_v44 = vpop.f32.mrb[5].mxu0 }
 0x23b   :  { %v735_v46 = vsel %vm152_vm2, %v732_v43, -inf }
 0x23c   :  { %736 = vmax.xlane.f32.xlu0 %v735_v46  ;;  %v909_v47 = vpop.f32.mrb[6].mxu0 }
 0x23d   :  { %v910_v48 = vadd.f32 %v4630_v45, %v909_v47  ;;  %v4028_v49 = vpop.f32.mrb[7].mxu0 }
 0x23f   :  { %v913_v50 = vsel %vm152_vm2, %v910_v48, -inf }
 0x240   :  { %914 = vmax.xlane.f32.xlu1 %v913_v50  ;;  %v1075_v51 = vpop.f32.mrb[8].mxu0 }
 0x241   :  { %v1076_v52 = vadd.f32 %v4630_v45, %v1075_v51  ;;  %v4038_v53 = vpop.f32.mrb[9].mxu0 }
 0x243   :  { %v1079_v54 = vsel %vm152_vm2, %v1076_v52, -inf }
 0x244   :  { %1080 = vmax.xlane.f32.xlu0 %v1079_v54  ;;  %v1245_v55 = vpop.f32.mrb[10].mxu0 }
 0x245   :  { %v1246_v56 = vadd.f32 %v4630_v45, %v1245_v55  ;;  %v4048_v57 = vpop.f32.mrb[11].mxu0 }
 0x247   :  { %v1249_v58 = vsel %vm152_vm2, %v1246_v56, -inf }
 0x248   :  { %1250 = vmax.xlane.f32.xlu1 %v1249_v58  ;;  %v1415_v59 = vpop.f32.mrb[12].mxu0 }
 0x249   :  { %v1416_v60 = vadd.f32 %v4630_v45, %v1415_v59  ;;  %v4058_v61 = vpop.f32.mrb[13].mxu0 }
 0x24b   :  { %v1419_v62 = vsel %vm152_vm2, %v1416_v60, -inf }
 0x24c   :  { %1420 = vmax.xlane.f32.xlu0 %v1419_v62 }
 0x259   :  { %746 = vrot.lane.b32.xlu1 %v4539_v12, %s5119_s1 }
 0x262   :  { %575 = vrot.lane.b32.xlu0 %v4539_v12, %s5117_s23 }
 0x2bd   :  { %v229_v0 = vpop.xlane.xlu0 %228 }
 0x2be   :  { %v230_v1 = vsub.f32 %v224_v31, %v229_v0 }
 0x2c0   :  { %v231_v2 = vmul.f32 1.442695, %v230_v1 }
 0x2c1   :  { %v395_v3 = vpop.xlane.xlu1 %394 }
 0x2c2   :  { %4333 = vpow2.f32 %v231_v2  ;;  %v396_v4 = vsub.f32 %v390_v35, %v395_v3 }
 0x2c4   :  { %v397_v6 = vmul.f32 1.442695, %v396_v4 }
 0x2c5   :  { %v566_v9 = vpop.xlane.xlu0 %565 }
 0x2c6   :  { %4335 = vpow2.f32 %v397_v6  ;;  %v567_v10 = vsub.f32 %v561_v39, %v566_v9 }
 0x2c8   :  { %v568_v11 = vmul.f32 1.442695, %v567_v10 }
 0x2c9   :  { %v737_v14 = vpop.xlane.xlu0 %736 }
 0x2ca   :  { %4337 = vpow2.f32 %v568_v11  ;;  %v738_v15 = vsub.f32 %v732_v43, %v737_v14 }
 0x2cc   :  { %v4334_v16 = vpop.eup %4333  ;;  %v739_v17 = vmul.f32 1.442695, %v738_v15 }
 0x2cd   :  { %v233_v12 = vsel %vm152_vm2, %v4334_v16, 0.0  ;;  %v915_v24 = vpop.xlane.xlu1 %914 }
 0x2ce   :  { %4339 = vpow2.f32 %v739_v17  ;;  %234 = vadd.xlane.f32.xlu1 %v233_v12  ;;  %v916_v25 = vsub.f32 %v910_v48, %v915_v24  ;;  %v1514_v24 = vld [vmem:[%s5106_s4 + $0x8] sm:$0xff] }
 0x2d0   :  { %v4336_v18 = vpop.eup %4335  ;;  %v917_v30 = vmul.f32 1.442695, %v916_v25 }
 0x2d1   :  { %v399_v19 = vsel %vm152_vm2, %v4336_v18, 0.0  ;;  %v1081_v26 = vpop.xlane.xlu0 %1080 }
 0x2d2   :  { %400 = vadd.xlane.f32.xlu0 %v399_v19  ;;  %v1082_v28 = vsub.f32 %v1076_v52, %v1081_v26  ;;  %4341 = vpow2.f32 %v917_v30  ;;  %v1516_v30 = vld [vmem:[%s5106_s4 + $0x18] sm:$0xff] }
 0x2d4   :  { %v4338_v20 = vpop.eup %4337  ;;  %v1083_v33 = vmul.f32 1.442695, %v1082_v28  ;;  %v1515_v28 = vld [vmem:[%s5106_s4 + $0x10] sm:$0xff] }
 0x2d5   :  { %v570_v21 = vsel %vm152_vm2, %v4338_v20, 0.0  ;;  %v1251_v27 = vpop.xlane.xlu1 %1250 }
 0x2d6   :  { %571 = vadd.xlane.f32.xlu1 %v570_v21  ;;  %v1252_v31 = vsub.f32 %v1246_v56, %v1251_v27  ;;  %4343 = vpow2.f32 %v1083_v33 }
 0x2d8   :  { %v4650_v22 = vpop.eup %4339  ;;  %v1253_v34 = vmul.f32 1.442695, %v1252_v31  ;;  %v4249_v31 = vpack.c.bf16 %v1516_v30, %v1515_v28 }
 0x2d9   :  { %v741_v23 = vsel %vm152_vm2, %v4650_v22, 0.0  ;;  %v1421_v32 = vpop.xlane.xlu0 %1420  ;;  %v747_v46 = vpop.permute.xlu1 %746 }
 0x2da   :  { %742 = vadd.xlane.f32.xlu0 %v741_v23  ;;  %v1422_v35 = vsub.f32 %v1416_v60, %v1421_v32  ;;  %4345 = vpow2.f32 %v1253_v34  ;;  %v1513_v23 = vld [vmem:[%s5106_s4] sm:$0xff] }
 0x2db   :  { %v4245_v26 = vpack.c.bf16 %v1514_v24, %v1513_v23 }
 0x2dc   :  { %v1423_v36 = vmul.f32 1.442695, %v1422_v35  ;;  %v4342_v37 = vpop.eup %4341 }
 0x2dd   :  { %v919_v39 = vsel %vm152_vm2, %v4342_v37, 0.0  ;;  %v576_v47 = vpop.permute.xlu0 %575  ;;  %4246 = vmatprep.subr.bf16.mxu0 %v4245_v26 }
 0x2de   :  { %4347 = vpow2.f32 %v1423_v36  ;;  %4248 = vmatpush3.bf16.msra.mxu0 %v4245_v26 }
 0x2df   :  { %4250 = vmatprep.subr.bf16.mxu0 %v4249_v31 }
 0x2e0   :  { %v4658_v38 = vpop.eup %4343 }
 0x2e1   :  { %v1085_v42 = vsel %vm152_vm2, %v4658_v38, 0.0 }
 0x2e2   :  { %4252 = vmatpush3.bf16.msra.mxu0 %v4249_v31 }
 0x2e4   :  { %v4661_v40 = vpop.eup %4345 }
 0x2e5   :  { %v1255_v41 = vsel %vm152_vm2, %v4661_v40, 0.0 }
 0x2e7   :  { %1090 = vrot.lane.b32.xlu1 %v4553_v13, %s5121_s17 }
 0x2e8   :  { %v4667_v43 = vpop.eup %4347 }
 0x2e9   :  { %v1425_v44 = vsel %vm152_vm2, %v4667_v43, 0.0 }
 0x2f0   :  { %924 = vrot.lane.b32.xlu0 %v4553_v13, %s5123_s18 }
 0x30b   :  { %920 = vadd.xlane.f32.xlu1 %v919_v39 }
 0x30f   :  { %1256 = vadd.xlane.f32.xlu1 %v1255_v41  ;;  %1086 = vadd.xlane.f32.xlu0 %v1085_v42 }
 0x313   :  { %1426 = vadd.xlane.f32.xlu1 %v1425_v44 }
 0x324   :  { %1430 = vrot.lane.b32.xlu1 %v4553_v13, %s5119_s1 }
 0x325   :  { %1260 = vrot.lane.b32.xlu0 %v4553_v13, %s5117_s23 }
 0x35b   :  { %v235_v48 = vpop.xlane.xlu1 %234 }
 0x35c   :  { %4349 = vrcp.f32 %v235_v48 }
 0x35f   :  { %v401_v49 = vpop.xlane.xlu0 %400 }
 0x360   :  { %4351 = vrcp.f32 %v401_v49 }
 0x363   :  { %v572_v50 = vpop.xlane.xlu1 %571 }
 0x364   :  { %4353 = vrcp.f32 %v572_v50 }
 0x366   :  { %v4350_v51 = vpop.eup %4349 }
 0x367   :  { %v237_v52 = vmul.f32 %v4350_v51, %v4334_v16  ;;  %v743_v53 = vpop.xlane.xlu0 %742  ;;  %v1091_v60 = vpop.permute.xlu1 %1090 }
 0x368   :  { %4355 = vrcp.f32 %v743_v53 }
 0x369   :  { %3992 = vmatmul.mubr.msk.f32.vlgmr.msra.gmra.mrb[4].mxu1 %vm152_vm2, %v237_v52 }
 0x36a   :  { %v4352_v54 = vpop.eup %4351  ;;  %4000 = vmatpush3.msra.mxu1 %v4645_v63  ;;  %4001 = vmatprep.mubr.msk.f32.mxu1 %vm4414_vm1, %v4413_v8 }
 0x36b   :  { %v403_v13 = vmul.f32 %v4352_v54, %v4336_v18  ;;  %4009 = vmatprep.subr.mxu1 %v4413_v8  ;;  %v925_v59 = vpop.permute.xlu0 %924 }
 0x36d   :  { %4002 = vmatmul.mubr.msk.f32.vlgmr.msra.gmra.mrb[6].mxu1 %vm152_vm2, %v403_v13 }
 0x36e   :  { %v4354_v55 = vpop.eup %4353  ;;  %4010 = vmatpush3.msra.mxu1 %v576_v47  ;;  %4011 = vmatprep.mubr.msk.f32.mxu1 %vm4414_vm1, %v4413_v8  ;;  %v3769_v47 = vld [vmem:[%s5107_s5] ss:$0 sm:$0xff] }
 0x36f   :  { %v574_v56 = vmul.f32 %v4354_v55, %v4338_v20  ;;  %4019 = vmatprep.subr.mxu1 %v4413_v8 }
 0x371   :  { %4012 = vmatmul.mubr.msk.f32.vlgmr.msra.gmra.mrb[8].mxu1 %vm152_vm2, %v574_v56 }
 0x372   :  { %v4356_v57 = vpop.eup %4355  ;;  %4020 = vmatpush3.msra.mxu1 %v747_v46  ;;  %4021 = vmatprep.mubr.msk.f32.mxu1 %vm4414_vm1, %v4413_v8 }
 0x373   :  { %v745_v58 = vmul.f32 %v4356_v57, %v4650_v22  ;;  %4029 = vmatprep.subr.mxu1 %v4413_v8 }
 0x375   :  { %4022 = vmatmul.mubr.msk.f32.vlgmr.msra.gmra.mrb[10].mxu1 %vm152_vm2, %v745_v58 }
 0x376   :  { %4030 = vmatpush3.msra.mxu1 %v925_v59  ;;  %4031 = vmatprep.mubr.msk.f32.mxu1 %vm4414_vm1, %v4413_v8 }
 0x377   :  { %4039 = vmatprep.subr.mxu1 %v4413_v8 }
 0x398   :  { %v921_v61 = vpop.xlane.xlu1 %920 }
 0x399   :  { %4357 = vrcp.f32 %v921_v61 }
 0x39c   :  { %v1257_v62 = vpop.xlane.xlu1 %1256  ;;  %v1087_v63 = vpop.xlane.xlu0 %1086 }
 0x39d   :  { %4359 = vrcp.f32 %v1087_v63 }
 0x39e   :  { %4361 = vrcp.f32 %v1257_v62 }
 0x3a0   :  { %v1427_v0 = vpop.xlane.xlu1 %1426  ;;  %v1261_v9 = vpop.permute.xlu0 %1260 }
 0x3a1   :  { %4363 = vrcp.f32 %v1427_v0  ;;  %v1653_v0 = vld [vmem:[%s5108_s8 + $0x8] sm:$0xff] }
 0x3a3   :  { %v4358_v1 = vpop.eup %4357 }
 0x3a4   :  { %v923_v2 = vmul.f32 %v4358_v1, %v4342_v37  ;;  %v1431_v14 = vpop.permute.xlu1 %1430 }
 0x3a6   :  { %4032 = vmatmul.mubr.msk.f32.vlgmr.msra.gmra.mrb[12].mxu1 %vm152_vm2, %v923_v2  ;;  %v1654_v2 = vld [vmem:[%s5108_s8 + $0x10] sm:$0xff] }
 0x3a7   :  { %4040 = vmatpush3.msra.mxu1 %v1091_v60  ;;  %4041 = vmatprep.mubr.msk.f32.mxu1 %vm4414_vm1, %v4413_v8  ;;  %v4360_v3 = vpop.eup %4359 }
 0x3a8   :  { %4049 = vmatprep.subr.mxu1 %v4413_v8  ;;  %v1089_v4 = vmul.f32 %v4360_v3, %v4658_v38  ;;  %v4362_v6 = vpop.eup %4361  ;;  %v1655_v3 = vld [vmem:[%s5108_s8 + $0x18] sm:$0xff] }
 0x3a9   :  { %v1259_v10 = vmul.f32 %v4362_v6, %v4661_v40  ;;  %v1746_v6 = vld [vmem:[%s5109_s10] sm:$0xff] }
 0x3aa   :  { %4042 = vmatmul.mubr.msk.f32.vlgmr.msra.gmra.mrb[14].mxu1 %vm152_vm2, %v1089_v4  ;;  %v4257_v4 = vpack.c.bf16 %v1655_v3, %v1654_v2  ;;  %v3785_v2 = vld [vmem:[%s5102_s2 + $0x38] sm:$0xff] }
 0x3ab   :  { %4050 = vmatpush3.msra.mxu1 %v1261_v9  ;;  %4051 = vmatprep.mubr.msk.f32.mxu1 %vm4414_vm1, %v4413_v8  ;;  %v4364_v11 = vpop.eup %4363  ;;  %v1747_v9 = vld [vmem:[%s5109_s10 + $0x8] sm:$0xff] }
 0x3ac   :  { %4059 = vmatprep.subr.mxu1 %v4413_v8  ;;  %v1429_v15 = vmul.f32 %v4364_v11, %v4667_v43  ;;  %v4261_v11 = vpack.c.bf16 %v1747_v9, %v1746_v6 }
 0x3ae   :  { %4052 = vmatmul.mubr.msk.f32.vlgmr.msra.gmra.mrb[16].mxu1 %vm152_vm2, %v1259_v10  ;;  %v1748_v10 = vld [vmem:[%s5109_s10 + $0x10] sm:$0xff]  ;;  %4262 = vmatprep.subr.bf16.mxu0 %v4261_v11 }
 0x3af   :  { %4060 = vmatpush3.msra.mxu1 %v1431_v14  ;;  %4061 = vmatprep.mubr.msk.f32.mxu1 %vm4414_vm1, %v4413_v8  ;;  %v1749_v14 = vld [vmem:[%s5109_s10 + $0x18] sm:$0xff] }
 0x3b2   :  { %4062 = vmatmul.mubr.msk.f32.vlgmr.msra.gmra.mrb[18].mxu1 %vm152_vm2, %v1429_v15  ;;  %v4265_v15 = vpack.c.bf16 %v1749_v14, %v1748_v10 }
 0x43c   :  { %v310_v16 = vpop.f32.mrb[4].mxu1 }
 0x43d   :  { %314 = vst.msk [vmem:[#allocation2] sm:$0xff] %vm152_vm2, %v310_v16  ;;  %v3993_v17 = vpop.f32.mrb[5].mxu1  ;;  %v1750_v16 = vld [vmem:[%s5109_s10 + $0x20] sm:$0xff] }
 0x43e   :  { %v1751_v17 = vld [vmem:[%s5109_s10 + $0x28] sm:$0xff] }
 0x440   :  { %v476_v12 = vpop.f32.mrb[6].mxu1 }
 0x441   :  { %481 = vrot.lane.b32.xlu0 %v476_v12, %s4426_s24  ;;  %v4003_v18 = vpop.f32.mrb[7].mxu1  ;;  %v4269_v12 = vpack.c.bf16 %v1751_v17, %v1750_v16  ;;  %v3780_v16 = vld [vmem:[%s5114_s12] ss:$0 sm:$0xff] }
 0x444   :  { %v647_v19 = vpop.f32.mrb[8].mxu1 }
 0x445   :  { %652 = vrot.lane.b32.xlu1 %v647_v19, %s5127_s25  ;;  %v4013_v20 = vpop.f32.mrb[9].mxu1 }
 0x448   :  { %v818_v21 = vpop.f32.mrb[10].mxu1 }
 0x449   :  { %823 = vrot.lane.b32.xlu1 %v818_v21, %s5125_s26  ;;  %v4023_v22 = vpop.f32.mrb[11].mxu1 }
 0x479   :  { %v996_v25 = vpop.f32.mrb[12].mxu1 }
 0x47a   :  { %1000 = vst.msk [vmem:[#allocation2 + $0x8] sm:$0xff] %vm152_vm2, %v996_v25  ;;  %v4033_v27 = vpop.f32.mrb[13].mxu1  ;;  %v3772_v25 = vld [vmem:[%s5110_s6] ss:$0 sm:$0xff] }
 0x47b   :  { %v3773_v27 = vld [vmem:[%s5111_s7] ss:$0 sm:$0xff] }
 0x47d   :  { %v1162_v32 = vpop.f32.mrb[14].mxu1 }
 0x47e   :  { %1167 = vrot.lane.b32.xlu0 %v1162_v32, %s4426_s24  ;;  %v4043_v33 = vpop.f32.mrb[15].mxu1 }
 0x481   :  { %v1332_v34 = vpop.f32.mrb[16].mxu1 }
 0x482   :  { %1337 = vrot.lane.b32.xlu0 %v1332_v34, %s5127_s25  ;;  %v4053_v35 = vpop.f32.mrb[17].mxu1 }
 0x483   :  { %v1752_v35 = vld [vmem:[%s5109_s10 + $0x30] sm:$0xff] }
 0x485   :  { %v1502_v36 = vpop.f32.mrb[18].mxu1 }
 0x486   :  { %1507 = vrot.lane.b32.xlu1 %v1502_v36, %s5125_s26  ;;  %v4063_v37 = vpop.f32.mrb[19].mxu1  ;;  %v1753_v36 = vld [vmem:[%s5109_s10 + $0x38] sm:$0xff] }
 0x487   :  { %v4273_v37 = vpack.c.bf16 %v1753_v36, %v1752_v35 }
 0x4b3   :  { %v482_v38 = vpop.permute.xlu0 %481 }
 0x4b4   :  { %485 = vst.msk [vmem:[#allocation2] sm:$0xff] %vm484_vm3, %v482_v38  ;;  %v3774_v38 = vld [vmem:[%s5112_s9] ss:$0 sm:$0xff] }
 0x4b7   :  { %v653_v39 = vpop.permute.xlu1 %652 }
 0x4b8   :  { %656 = vst.msk [vmem:[#allocation2] sm:$0xff] %vm655_vm4, %v653_v39 }
 0x4bb   :  { %v824_v40 = vpop.permute.xlu1 %823 }
 0x4bc   :  { %827 = vst.msk [vmem:[#allocation2] sm:$0xff] %vm826_vm5, %v824_v40 }
 0x4c3   :  { %v1511_v41 = vld [vmem:[#allocation2] sm:$0xff] }
 0x4c4   :  { %4072 = vmatprep.mubr.msk.f32.mxu0 %vm60_vm0, %v1511_v41 }
 0x4f0   :  { %v1168_v42 = vpop.permute.xlu0 %1167 }
 0x4f1   :  { %1170 = vst.msk [vmem:[#allocation2 + $0x8] sm:$0xff] %vm484_vm3, %v1168_v42 }
 0x4f4   :  { %v1338_v43 = vpop.permute.xlu0 %1337 }
 0x4f5   :  { %1340 = vst.msk [vmem:[#allocation2 + $0x8] sm:$0xff] %vm655_vm4, %v1338_v43 }
 0x4f8   :  { %v1508_v44 = vpop.permute.xlu1 %1507 }
 0x4f9   :  { %1510 = vst.msk [vmem:[#allocation2 + $0x8] sm:$0xff] %vm826_vm5, %v1508_v44 }
 0x500   :  { %v1512_v46 = vld [vmem:[#allocation2 + $0x8] sm:$0xff] }
 0x501   :  { %4073 = vmatmul.mubr.msk.f32.vlgmr.msra.gmra.mrb[14].mxu0 %vm60_vm0, %v1512_v46  ;;  %v3777_v46 = vld [vmem:[%s5113_s11] ss:$0 sm:$0xff] }
 0x502   :  { %4264 = vmatpush3.bf16.msra.mxu0 %v4261_v11 }
 0x503   :  { %4266 = vmatprep.subr.bf16.mxu0 %v4265_v15 }
 0x506   :  { %4268 = vmatpush3.bf16.msra.mxu0 %v4265_v15 }
 0x507   :  { %4270 = vmatprep.subr.bf16.mxu0 %v4269_v12 }
 0x50a   :  { %4272 = vmatpush3.bf16.msra.mxu0 %v4269_v12 }
 0x50b   :  { %4274 = vmatprep.subr.bf16.mxu0 %v4273_v37 }
 0x50e   :  { %4276 = vmatpush3.bf16.msra.mxu0 %v4273_v37 }
 0x50f   :  { %4126 = vmatprep.subr.mxu0 %v4413_v8 }
 0x5d4   :  { %v4074_v48 = vpop.f32.mrb[14].mxu0 }
 0x5d5   :  { %v1602_v49 = vadd.f32 %v4074_v48, %v3769_v47  ;;  %v1596_v50 = vpop.f32.mrb[15].mxu0 }
 0x5d6   :  { %v1597_v51 = vadd.f32 %v3769_v47, %v1596_v50 }
 0x5d7   :  { %v1606_v52 = vadd.f32 %v1602_v49, %v4526_v7 }
 0x5d8   :  { %v1605_v53 = vadd.f32 %v1597_v51, %v4519_v5  ;;  %v1652_v5 = vld [vmem:[%s5108_s8] sm:$0xff] }
 0x5d9   :  { %v1610_v54 = vsel %vm60_vm0, %v1606_v52, 0.0  ;;  %v4253_v1 = vpack.c.bf16 %v1653_v0, %v1652_v5  ;;  %v3783_v5 = vld [vmem:[%s5102_s2 + $0x28] sm:$0xff] }
 0x5da   :  { %1611 = vadd.xlane.f32.xlu1 %v1610_v54  ;;  %v1607_v13 = vsel %vm60_vm0, %v1605_v53, 0.0 }
 0x5db   :  { %1608 = vadd.xlane.f32.xlu0 %v1607_v13  ;;  %4254 = vmatprep.subr.bf16.mxu1 %v4253_v1 }
 0x5dc   :  { %4256 = vmatpush3.bf16.msra.mxu1 %v4253_v1  ;;  %v3784_v1 = vld [vmem:[%s5102_s2 + $0x30] sm:$0xff] }
 0x5dd   :  { %4258 = vmatprep.subr.bf16.mxu1 %v4257_v4  ;;  %v4281_v3 = vpack.c.bf16 %v3785_v2, %v3784_v1 }
 0x5e0   :  { %4260 = vmatpush3.bf16.msra.mxu1 %v4257_v4 }
 0x667   :  { %v1612_v55 = vpop.xlane.xlu1 %1611 }
 0x668   :  { %v1615_v56 = vmul.f32 0.03125, %v1612_v55  ;;  %v1609_v57 = vpop.xlane.xlu0 %1608 }
 0x669   :  { %v1614_v58 = vmul.f32 0.03125, %v1609_v57 }
 0x66a   :  { %v1617_v59 = vsub.f32 %v1606_v52, %v1615_v56 }
 0x66b   :  { %v1616_v60 = vsub.f32 %v1605_v53, %v1614_v58 }
 0x66c   :  { %v1619_v63 = vmul.f32 %v1617_v59, %v1617_v59 }
 0x66d   :  { %v1618_v61 = vmul.f32 %v1616_v60, %v1616_v60 }
 0x66e   :  { %v1623_v7 = vsel %vm60_vm0, %v1619_v63, 0.0 }
 0x66f   :  { %v1620_v62 = vsel %vm60_vm0, %v1618_v61, 0.0 }
 0x670   :  { %1621 = vadd.xlane.f32.xlu0 %v1620_v62 }
 0x674   :  { %1624 = vadd.xlane.f32.xlu0 %v1623_v7  ;;  %v3782_v7 = vld [vmem:[%s5102_s2 + $0x20] sm:$0xff] }
 0x675   :  { %v4277_v0 = vpack.c.bf16 %v3783_v5, %v3782_v7 }
 0x677   :  { %4278 = vmatprep.subr.bf16.mxu1 %v4277_v0 }
 0x6fd   :  { %v1622_v18 = vpop.xlane.xlu0 %1621 }
 0x6fe   :  { %v1626_v19 = vmul.f32 0.03125, %v1622_v18 }
 0x700   :  { %v1628_v20 = vadd.f32 1e-05, %v1626_v19 }
 0x701   :  { %v1625_v21 = vpop.xlane.xlu0 %1624 }
 0x702   :  { %4365 = vrsqrt.f32 %v1628_v20  ;;  %v1627_v22 = vmul.f32 0.03125, %v1625_v21  ;;  %v3781_v20 = vld [vmem:[%s5115_s13] ss:$0 sm:$0xff] }
 0x704   :  { %v1629_v23 = vadd.f32 1e-05, %v1627_v22 }
 0x706   :  { %4367 = vrsqrt.f32 %v1629_v23 }
 0x70c   :  { %v4366_v24 = vpop.eup %4365 }
 0x70d   :  { %v1632_v26 = vmul.f32 %v4366_v24, %v1616_v60  ;;  %v3787_v24 = vld [vmem:[%s5104_s3 + $0x1] ss:$0 sm:$0xff]  ;;  %s5129_s3 = smov 64  }
 0x70f   :  { %v1641_v28 = vmul.f32 %v3772_v25, %v1632_v26 }
 0x710   :  { %v4368_v30 = vpop.eup %4367 }
 0x711   :  { %v1633_v31 = vmul.f32 %v4368_v30, %v1617_v59  ;;  %v1650_v32 = vadd.f32 %v3773_v27, %v1641_v28 }
 0x713   :  { %v1642_v33 = vmul.f32 %v3772_v25, %v1633_v31  ;;  %4083 = vmatprep.mubr.msk.f32.mxu1 %vm60_vm0, %v1650_v32 }
 0x715   :  { %v1651_v34 = vadd.f32 %v3773_v27, %v1642_v33 }
 0x717   :  { %4084 = vmatmul.mubr.msk.f32.vlgmr.msra.gmra.mrb[20].mxu1 %vm60_vm0, %v1651_v34 }
 0x718   :  { %4280 = vmatpush3.bf16.msra.mxu1 %v4277_v0 }
 0x719   :  { %4282 = vmatprep.subr.bf16.mxu1 %v4281_v3 }
 0x71c   :  { %4284 = vmatpush3.bf16.msra.mxu1 %v4281_v3 }
 0x71d   :  { %4116 = vmatprep.subr.mxu1 %v4413_v8 }
 0x7ea   :  { %v4085_v39 = vpop.f32.mrb[20].mxu1 }
 0x7eb   :  { %v1741_v40 = vadd.f32 %v4085_v39, %v3774_v38  ;;  %v1735_v41 = vpop.f32.mrb[21].mxu1 }
 0x7ec   :  { %v1736_v42 = vadd.f32 %v3774_v38, %v1735_v41 }
 0x7ed   :  { %v1745_v44 = vmax.f32 %v1741_v40, 0.0 }
 0x7ee   :  { %v1744_v43 = vmax.f32 %v1736_v42, 0.0 }
 0x7f0   :  { %4102 = vmatprep.mubr.msk.f32.mxu0 %vm1761_vm6, %v1744_v43 }
 0x7f1   :  { %4103 = vmatmul.mubr.msk.f32.vlgmr.msra.gmra.mrb[16].mxu0 %vm1761_vm6, %v1745_v44 }
 0x7f2   :  { %4128 = vmatprep.mubr.msk.f32.mxu0 %vm4414_vm1, %v4413_v8 }
 0x8c4   :  { %v4104_v47 = vpop.f32.mrb[16].mxu0 }
 0x8c5   :  { %v1840_v48 = vadd.f32 %v4104_v47, %v3777_v46  ;;  %v1834_v49 = vpop.f32.mrb[17].mxu0 }
 0x8c6   :  { %v1835_v50 = vadd.f32 %v3777_v46, %v1834_v49 }
 0x8c7   :  { %v1844_v51 = vadd.f32 %v1840_v48, %v1651_v34 }
 0x8c8   :  { %v1843_v52 = vadd.f32 %v1835_v50, %v1650_v32 }
 0x8c9   :  { %v1848_v53 = vsel %vm60_vm0, %v1844_v51, 0.0 }
 0x8ca   :  { %1849 = vadd.xlane.f32.xlu0 %v1848_v53  ;;  %v1845_v54 = vsel %vm60_vm0, %v1843_v52, 0.0 }
 0x8cb   :  { %1846 = vadd.xlane.f32.xlu1 %v1845_v54 }
 0x957   :  { %v1850_v13 = vpop.xlane.xlu0 %1849 }
 0x958   :  { %v1852_v55 = vmul.f32 0.03125, %v1850_v13  ;;  %v1847_v56 = vpop.xlane.xlu1 %1846 }
 0x959   :  { %v1851_v57 = vmul.f32 0.03125, %v1847_v56 }
 0x95a   :  { %v1854_v58 = vsub.f32 %v1844_v51, %v1852_v55 }
 0x95b   :  { %v1853_v59 = vsub.f32 %v1843_v52, %v1851_v57 }
 0x95c   :  { %v1856_v60 = vmul.f32 %v1854_v58, %v1854_v58 }
 0x95d   :  { %v1855_v61 = vmul.f32 %v1853_v59, %v1853_v59 }
 0x95e   :  { %v1860_v62 = vsel %vm60_vm0, %v1856_v60, 0.0 }
 0x95f   :  { %1861 = vadd.xlane.f32.xlu0 %v1860_v62  ;;  %v1857_v63 = vsel %vm60_vm0, %v1855_v61, 0.0 }
 0x960   :  { %1858 = vadd.xlane.f32.xlu1 %v1857_v63 }
 0x9ec   :  { %v1862_v4 = vpop.xlane.xlu0 %1861 }
 0x9ed   :  { %v1864_v6 = vmul.f32 0.03125, %v1862_v4  ;;  %v1859_v9 = vpop.xlane.xlu1 %1858 }
 0x9ee   :  { %v1863_v10 = vmul.f32 0.03125, %v1859_v9 }
 0x9ef   :  { %v1866_v11 = vadd.f32 1e-05, %v1864_v6 }
 0x9f0   :  { %v1865_v14 = vadd.f32 1e-05, %v1863_v10 }
 0x9f1   :  { %4369 = vrsqrt.f32 %v1866_v11 }
 0x9f2   :  { %4371 = vrsqrt.f32 %v1865_v14 }
 0x9fb   :  { %v4370_v15 = vpop.eup %4369 }
 0x9fc   :  { %v4372_v17 = vpop.eup %4371  ;;  %v1870_v12 = vmul.f32 %v4370_v15, %v1854_v58 }
 0x9fd   :  { %v1869_v18 = vmul.f32 %v4372_v17, %v1853_v59 }
 0x9fe   :  { %v1879_v19 = vmul.f32 %v3780_v16, %v1870_v12 }
 0x9ff   :  { %v1878_v21 = vmul.f32 %v3780_v16, %v1869_v18 }
 0xa00   :  { %v4825_v23 = vadd.f32 %v3781_v20, %v1879_v19 }
 0xa01   :  { %v4823_v22 = vadd.f32 %v3781_v20, %v1878_v21 }
 0xa03   :  { %4113 = vmatprep.mubr.msk.f32.mxu1 %vm60_vm0, %v4823_v22 }
 0xa04   :  { %4114 = vmatmul.mubr.msk.f32.vlgmr.msra.gmra.mrb[22].mxu1 %vm60_vm0, %v4825_v23 }
 0xa05   :  { %4118 = vmatprep.mubr.msk.f32.mxu1 %vm4414_vm1, %v4413_v8 }
 0xad7   :  { %v4115_v25 = vpop.f32.mrb[22].mxu1 }
 0xad8   :  { %v1974_v26 = vpop.f32.mrb[23].mxu1  ;;  %v4850_v28 = vadd.f32 %v4115_v25, %v3787_v24 }
 0xad9   :  { %v4836_v27 = vadd.f32 %v3787_v24, %v1974_v26 }
 0xadb   :  { %2157 = vrot.lane.b32.xlu0 %v4836_v27, %s4418_s29  ;;  %1991 = vrot.lane.b32.xlu1 %v4836_v27, %s4416_s27 }
 0xadf   :  { %2325 = vrot.lane.b32.xlu0 %v4836_v27, %s4420_s15  ;;  %2155 = vrot.lane.b32.xlu1 %v4836_v27, %s4415_s0 }
 0xae3   :  { %2495 = vrot.lane.b32.xlu0 %v4836_v27, %s4421_s16  ;;  %2327 = vrot.lane.b32.xlu1 %v4836_v27, %s4417_s28 }
 0xae7   :  { %2839 = vrot.lane.b32.xlu0 %v4850_v28, %s4418_s29  ;;  %2497 = vrot.lane.b32.xlu1 %v4836_v27, %s4419_s30  ;;  %s5130_s29 = smov 56  }
 0xaeb   :  { %3009 = vrot.lane.b32.xlu0 %v4850_v28, %s4417_s28  ;;  %2673 = vrot.lane.b32.xlu1 %v4850_v28, %s4416_s27  ;;  %s5132_s27 = smov 48   ;;  %s5133_s28 = smov 16  }
 0xaef   :  { %3179 = vrot.lane.b32.xlu0 %v4850_v28, %s4419_s30  ;;  %2837 = vrot.lane.b32.xlu1 %v4850_v28, %s4415_s0  ;;  %s5131_s0 = smov 40   ;;  %s5134_s30 = smov 24  }
 0xaf3   :  { %2078 = vrot.lane.b32.xlu0 %v4836_v27, %s5129_s3  ;;  %3007 = vrot.lane.b32.xlu1 %v4850_v28, %s4420_s15 }
 0xaf7   :  { %3177 = vrot.lane.b32.xlu1 %v4850_v28, %s4421_s16 }
 0xafb   :  { %2244 = vrot.lane.b32.xlu1 %v4836_v27, %s5130_s29 }
 0xb4d   :  { %v2158_v30 = vpop.permute.xlu0 %2157  ;;  %v1992_v31 = vpop.permute.xlu1 %1991 }
 0xb4e   :  { %4117 = vmatpush3.xpose.msk.msra.mxu1 %vm152_vm2, %v1992_v31  ;;  %4127 = vmatpush3.xpose.msk.msra.mxu0 %vm152_vm2, %v2158_v30 }
 0xb4f   :  { %4136 = vmatprep.subr.mxu0 %v4413_v8  ;;  %4121 = vmatprep.subr.mxu1 %v4413_v8 }
 0xb51   :  { %v2326_v32 = vpop.permute.xlu0 %2325  ;;  %4119 = vmatmul.mubr.msk.f32.vlgmr.msra.gmra.mrb[24].mxu1 %vm152_vm2, %v4836_v27  ;;  %v2156_v33 = vpop.permute.xlu1 %2155 }
 0xb52   :  { %4129 = vmatmul.mubr.msk.f32.vlgmr.msra.gmra.mrb[18].mxu0 %vm152_vm2, %v2156_v33  ;;  %4123 = vmatprep.mubr.msk.f32.mxu1 %vm4414_vm1, %v4413_v8 }
 0xb53   :  { %4138 = vmatprep.mubr.msk.f32.mxu0 %vm4414_vm1, %v4413_v8 }
 0xb55   :  { %v2496_v34 = vpop.permute.xlu0 %2495  ;;  %v2328_v35 = vpop.permute.xlu1 %2327 }
 0xb56   :  { %4137 = vmatpush3.xpose.msk.msra.mxu0 %vm152_vm2, %v2328_v35 }
 0xb57   :  { %4146 = vmatprep.subr.mxu0 %v4413_v8 }
 0xb59   :  { %v2840_v36 = vpop.permute.xlu0 %2839  ;;  %4139 = vmatmul.mubr.msk.f32.vlgmr.msra.gmra.mrb[20].mxu0 %vm152_vm2, %v2326_v32  ;;  %v2498_v37 = vpop.permute.xlu1 %2497 }
 0xb5a   :  { %4147 = vmatpush3.xpose.msk.msra.mxu0 %vm152_vm2, %v2498_v37  ;;  %4148 = vmatprep.mubr.msk.f32.mxu0 %vm4414_vm1, %v4413_v8 }
 0xb5b   :  { %4156 = vmatprep.subr.mxu0 %v4413_v8 }
 0xb5d   :  { %v3010_v38 = vpop.permute.xlu0 %3009  ;;  %4149 = vmatmul.mubr.msk.f32.vlgmr.msra.gmra.mrb[22].mxu0 %vm152_vm2, %v2496_v34  ;;  %v2674_v39 = vpop.permute.xlu1 %2673 }
 0xb5e   :  { %4157 = vmatpush3.xpose.msk.msra.mxu0 %vm152_vm2, %v2674_v39  ;;  %4158 = vmatprep.mubr.msk.f32.mxu0 %vm4414_vm1, %v4413_v8 }
 0xb5f   :  { %4166 = vmatprep.subr.mxu0 %v4413_v8 }
 0xb61   :  { %v3180_v40 = vpop.permute.xlu0 %3179  ;;  %4159 = vmatmul.mubr.msk.f32.vlgmr.msra.gmra.mrb[24].mxu0 %vm152_vm2, %v4850_v28  ;;  %v2838_v41 = vpop.permute.xlu1 %2837 }
 0xb62   :  { %4167 = vmatpush3.xpose.msk.msra.mxu0 %vm152_vm2, %v2840_v36  ;;  %4168 = vmatprep.mubr.msk.f32.mxu0 %vm4414_vm1, %v4413_v8 }
 0xb63   :  { %4176 = vmatprep.subr.mxu0 %v4413_v8 }
 0xb65   :  { %v2079_v42 = vpop.permute.xlu0 %2078  ;;  %4169 = vmatmul.mubr.msk.f32.vlgmr.msra.gmra.mrb[26].mxu0 %vm152_vm2, %v2838_v41  ;;  %v3008_v43 = vpop.permute.xlu1 %3007 }
 0xb66   :  { %4122 = vmatpush3.msra.mxu1 %v2079_v42  ;;  %4177 = vmatpush3.xpose.msk.msra.mxu0 %vm152_vm2, %v3010_v38 }
 0xb67   :  { %4178 = vmatprep.mubr.msk.f32.mxu0 %vm4414_vm1, %v4413_v8  ;;  %4186 = vmatprep.subr.mxu0 %v4413_v8 }
 0xb68   :  { %4131 = vmatprep.subr.mxu1 %v4413_v8 }
 0xb69   :  { %4179 = vmatmul.mubr.msk.f32.vlgmr.msra.gmra.mrb[28].mxu0 %vm152_vm2, %v3008_v43  ;;  %v3178_v44 = vpop.permute.xlu1 %3177 }
 0xb6a   :  { %4187 = vmatpush3.xpose.msk.msra.mxu0 %vm152_vm2, %v3180_v40  ;;  %4188 = vmatprep.mubr.msk.f32.mxu0 %vm4414_vm1, %v4413_v8 }
 0xb6d   :  { %4189 = vmatmul.mubr.msk.f32.vlgmr.msra.gmra.mrb[30].mxu0 %vm152_vm2, %v3178_v44  ;;  %v4932_v15 = vpop.permute.xlu1 %2244 }
 0xc24   :  { %v2063_v46 = vpop.f32.mrb[24].mxu1 }
 0xc25   :  { %v2064_v47 = vadd.f32 %v4618_v29, %v2063_v46  ;;  %v4120_v48 = vpop.f32.mrb[25].mxu1  ;;  %v2229_v49 = vpop.f32.mrb[18].mxu0 }
 0xc26   :  { %v2230_v50 = vadd.f32 %v4618_v29, %v2229_v49  ;;  %v4130_v51 = vpop.f32.mrb[19].mxu0 }
 0xc27   :  { %v2067_v52 = vsel %vm152_vm2, %v2064_v47, -inf }
 0xc28   :  { %2068 = vmax.xlane.f32.xlu0 %v2067_v52  ;;  %v2233_v53 = vsel %vm152_vm2, %v2230_v50, -inf }
 0xc29   :  { %2234 = vmax.xlane.f32.xlu1 %v2233_v53 }
 0xc2c   :  { %v2399_v54 = vpop.f32.mrb[20].mxu0 }
 0xc2d   :  { %v2400_v13 = vadd.f32 %v4618_v29, %v2399_v54  ;;  %v4140_v55 = vpop.f32.mrb[21].mxu0 }
 0xc2f   :  { %v2403_v56 = vsel %vm152_vm2, %v2400_v13, -inf }
 0xc30   :  { %2404 = vmax.xlane.f32.xlu0 %v2403_v56  ;;  %v2569_v57 = vpop.f32.mrb[22].mxu0 }
 0xc31   :  { %v2570_v58 = vadd.f32 %v4618_v29, %v2569_v57  ;;  %v4150_v59 = vpop.f32.mrb[23].mxu0 }
 0xc33   :  { %v2573_v60 = vsel %vm152_vm2, %v2570_v58, -inf }
 0xc34   :  { %2574 = vmax.xlane.f32.xlu0 %v2573_v60  ;;  %v2745_v61 = vpop.f32.mrb[24].mxu0 }
 0xc35   :  { %v2746_v62 = vadd.f32 %v4630_v45, %v2745_v61  ;;  %v4160_v63 = vpop.f32.mrb[25].mxu0 }
 0xc37   :  { %v2749_v7 = vsel %vm152_vm2, %v2746_v62, -inf }
 0xc38   :  { %2750 = vmax.xlane.f32.xlu1 %v2749_v7  ;;  %v2911_v5 = vpop.f32.mrb[26].mxu0 }
 0xc39   :  { %v2912_v0 = vadd.f32 %v4630_v45, %v2911_v5  ;;  %v4170_v1 = vpop.f32.mrb[27].mxu0 }
 0xc3b   :  { %v2915_v2 = vsel %vm152_vm2, %v2912_v0, -inf }
 0xc3c   :  { %2916 = vmax.xlane.f32.xlu0 %v2915_v2  ;;  %v3081_v3 = vpop.f32.mrb[28].mxu0 }
 0xc3d   :  { %v3082_v29 = vadd.f32 %v4630_v45, %v3081_v3  ;;  %v4180_v4 = vpop.f32.mrb[29].mxu0 }
 0xc3f   :  { %v3085_v6 = vsel %vm152_vm2, %v3082_v29, -inf }
 0xc40   :  { %3086 = vmax.xlane.f32.xlu1 %v3085_v6  ;;  %v3251_v9 = vpop.f32.mrb[30].mxu0 }
 0xc41   :  { %v3252_v10 = vadd.f32 %v4630_v45, %v3251_v9  ;;  %v4190_v11 = vpop.f32.mrb[31].mxu0 }
 0xc43   :  { %v3255_v14 = vsel %vm152_vm2, %v3252_v10, -inf }
 0xc44   :  { %3256 = vmax.xlane.f32.xlu0 %v3255_v14 }
 0xc51   :  { %2584 = vrot.lane.b32.xlu1 %v4836_v27, %s5131_s0 }
 0xc5a   :  { %2414 = vrot.lane.b32.xlu0 %v4836_v27, %s5132_s27 }
 0xcb5   :  { %v2069_v16 = vpop.xlane.xlu0 %2068 }
 0xcb6   :  { %v2070_v17 = vsub.f32 %v2064_v47, %v2069_v16  ;;  %v2235_v12 = vpop.xlane.xlu1 %2234 }
 0xcb7   :  { %v2236_v18 = vsub.f32 %v2230_v50, %v2235_v12 }
 0xcb8   :  { %v2071_v19 = vmul.f32 1.442695, %v2070_v17 }
 0xcb9   :  { %v2237_v20 = vmul.f32 1.442695, %v2236_v18 }
 0xcba   :  { %4373 = vpow2.f32 %v2071_v19 }
 0xcbb   :  { %4375 = vpow2.f32 %v2237_v20 }
 0xcbd   :  { %v2405_v45 = vpop.xlane.xlu0 %2404 }
 0xcbe   :  { %v2406_v21 = vsub.f32 %v2400_v13, %v2405_v45 }
 0xcc0   :  { %v2407_v24 = vmul.f32 1.442695, %v2406_v21 }
 0xcc1   :  { %v2575_v25 = vpop.xlane.xlu0 %2574 }
 0xcc2   :  { %4377 = vpow2.f32 %v2407_v24  ;;  %v2576_v26 = vsub.f32 %v2570_v58, %v2575_v25 }
 0xcc4   :  { %v4374_v30 = vpop.eup %4373  ;;  %v2577_v31 = vmul.f32 1.442695, %v2576_v26 }
 0xcc5   :  { %v4376_v32 = vpop.eup %4375  ;;  %v2073_v27 = vsel %vm152_vm2, %v4374_v30, 0.0  ;;  %v2751_v38 = vpop.xlane.xlu1 %2750 }
 0xcc6   :  { %4379 = vpow2.f32 %v2577_v31  ;;  %2074 = vadd.xlane.f32.xlu1 %v2073_v27  ;;  %v2239_v33 = vsel %vm152_vm2, %v4376_v32, 0.0  ;;  %v2752_v39 = vsub.f32 %v2746_v62, %v2751_v38  ;;  %v3819_v38 = vld [vmem:[%s5106_s4 + $0x30] sm:$0xff] }
 0xcc7   :  { %2240 = vadd.xlane.f32.xlu0 %v2239_v33 }
 0xcc8   :  { %v2753_v43 = vmul.f32 1.442695, %v2752_v39  ;;  %v3820_v39 = vld [vmem:[%s5106_s4 + $0x38] sm:$0xff] }
 0xcc9   :  { %v2917_v40 = vpop.xlane.xlu0 %2916 }
 0xcca   :  { %v2918_v42 = vsub.f32 %v2912_v0, %v2917_v40  ;;  %4381 = vpow2.f32 %v2753_v43 }
 0xccc   :  { %v4378_v34 = vpop.eup %4377  ;;  %v2919_v47 = vmul.f32 1.442695, %v2918_v42 }
 0xccd   :  { %v2409_v35 = vsel %vm152_vm2, %v4378_v34, 0.0  ;;  %v3087_v41 = vpop.xlane.xlu1 %3086 }
 0xcce   :  { %2410 = vadd.xlane.f32.xlu1 %v2409_v35  ;;  %v3088_v44 = vsub.f32 %v3082_v29, %v3087_v41  ;;  %4383 = vpow2.f32 %v2919_v47  ;;  %v3818_v35 = vld [vmem:[%s5106_s4 + $0x28] sm:$0xff]  ;;  %v4289_v41 = vpack.c.bf16 %v3820_v39, %v3819_v38 }
 0xcd0   :  { %v4937_v36 = vpop.eup %4379  ;;  %v3089_v48 = vmul.f32 1.442695, %v3088_v44 }
 0xcd1   :  { %v2579_v37 = vsel %vm152_vm2, %v4937_v36, 0.0  ;;  %v3257_v46 = vpop.xlane.xlu0 %3256  ;;  %v2585_v58 = vpop.permute.xlu1 %2584 }
 0xcd2   :  { %2580 = vadd.xlane.f32.xlu0 %v2579_v37  ;;  %v3258_v49 = vsub.f32 %v3252_v10, %v3257_v46  ;;  %4385 = vpow2.f32 %v3089_v48 }
 0xcd4   :  { %v3259_v50 = vmul.f32 1.442695, %v3258_v49  ;;  %v4382_v51 = vpop.eup %4381 }
 0xcd5   :  { %v2755_v53 = vsel %vm152_vm2, %v4382_v51, 0.0  ;;  %v2415_v59 = vpop.permute.xlu0 %2414 }
 0xcd6   :  { %4387 = vpow2.f32 %v3259_v50 }
 0xcd8   :  { %v4945_v52 = vpop.eup %4383 }
 0xcd9   :  { %v2921_v13 = vsel %vm152_vm2, %v4945_v52, 0.0 }
 0xcdc   :  { %v4948_v54 = vpop.eup %4385 }
 0xcdd   :  { %v3091_v55 = vsel %vm152_vm2, %v4948_v54, 0.0 }
 0xcdf   :  { %2926 = vrot.lane.b32.xlu1 %v4850_v28, %s5130_s29 }
 0xce0   :  { %v4954_v56 = vpop.eup %4387 }
 0xce1   :  { %v3261_v57 = vsel %vm152_vm2, %v4954_v56, 0.0 }
 0xce8   :  { %2760 = vrot.lane.b32.xlu0 %v4850_v28, %s5129_s3 }
 0xd03   :  { %2756 = vadd.xlane.f32.xlu1 %v2755_v53 }
 0xd07   :  { %2922 = vadd.xlane.f32.xlu0 %v2921_v13  ;;  %3092 = vadd.xlane.f32.xlu1 %v3091_v55 }
 0xd0b   :  { %3262 = vadd.xlane.f32.xlu1 %v3261_v57 }
 0xd1c   :  { %3266 = vrot.lane.b32.xlu1 %v4850_v28, %s5131_s0 }
 0xd1d   :  { %3096 = vrot.lane.b32.xlu0 %v4850_v28, %s5132_s27 }
 0xd53   :  { %v2075_v60 = vpop.xlane.xlu1 %2074 }
 0xd54   :  { %4389 = vrcp.f32 %v2075_v60  ;;  %v2241_v61 = vpop.xlane.xlu0 %2240 }
 0xd55   :  { %4391 = vrcp.f32 %v2241_v61 }
 0xd5b   :  { %v2411_v62 = vpop.xlane.xlu1 %2410 }
 0xd5c   :  { %4393 = vrcp.f32 %v2411_v62 }
 0xd5e   :  { %v4390_v63 = vpop.eup %4389 }
 0xd5f   :  { %v2077_v7 = vmul.f32 %v4390_v63, %v4374_v30  ;;  %v2581_v5 = vpop.xlane.xlu0 %2580  ;;  %v4392_v0 = vpop.eup %4391 }
 0xd60   :  { %4395 = vrcp.f32 %v2581_v5  ;;  %v2243_v28 = vmul.f32 %v4392_v0, %v4376_v32  ;;  %v2927_v6 = vpop.permute.xlu1 %2926 }
 0xd61   :  { %4124 = vmatmul.mubr.msk.f32.vlgmr.msra.gmra.mrb[26].mxu1 %vm152_vm2, %v2077_v7 }
 0xd62   :  { %4132 = vmatpush3.msra.mxu1 %v4932_v15  ;;  %4133 = vmatprep.mubr.msk.f32.mxu1 %vm4414_vm1, %v4413_v8 }
 0xd63   :  { %4141 = vmatprep.subr.mxu1 %v4413_v8  ;;  %v2761_v4 = vpop.permute.xlu0 %2760 }
 0xd65   :  { %4134 = vmatmul.mubr.msk.f32.vlgmr.msra.gmra.mrb[28].mxu1 %vm152_vm2, %v2243_v28 }
 0xd66   :  { %v4394_v1 = vpop.eup %4393  ;;  %4142 = vmatpush3.msra.mxu1 %v2415_v59  ;;  %4143 = vmatprep.mubr.msk.f32.mxu1 %vm4414_vm1, %v4413_v8 }
 0xd67   :  { %v2413_v2 = vmul.f32 %v4394_v1, %v4378_v34  ;;  %4151 = vmatprep.subr.mxu1 %v4413_v8  ;;  %v3817_v34 = vld [vmem:[%s5106_s4 + $0x20] sm:$0xff] }
 0xd69   :  { %4144 = vmatmul.mubr.msk.f32.vlgmr.msra.gmra.mrb[30].mxu1 %vm152_vm2, %v2413_v2 }
 0xd6a   :  { %v4396_v3 = vpop.eup %4395  ;;  %4152 = vmatpush3.msra.mxu1 %v2585_v58  ;;  %4153 = vmatprep.mubr.msk.f32.mxu1 %vm4414_vm1, %v4413_v8 }
 0xd6b   :  { %v2583_v29 = vmul.f32 %v4396_v3, %v4937_v36  ;;  %4161 = vmatprep.subr.mxu1 %v4413_v8  ;;  %v4285_v36 = vpack.c.bf16 %v3818_v35, %v3817_v34  ;;  %v3828_v35 = vld [vmem:[%s5111_s7 + $0x1] ss:$0 sm:$0xff] }
 0xd6d   :  { %4154 = vmatmul.mubr.msk.f32.vlgmr.msra.gmra.mrb[32].mxu1 %vm152_vm2, %v2583_v29  ;;  %4286 = vmatprep.subr.bf16.mxu0 %v4285_v36 }
 0xd6e   :  { %4162 = vmatpush3.msra.mxu1 %v2761_v4  ;;  %4163 = vmatprep.mubr.msk.f32.mxu1 %vm4414_vm1, %v4413_v8 }
 0xd6f   :  { %4171 = vmatprep.subr.mxu1 %v4413_v8  ;;  %4288 = vmatpush3.bf16.msra.mxu0 %v4285_v36 }
 0xd70   :  { %4290 = vmatprep.subr.bf16.mxu0 %v4289_v41 }
 0xd73   :  { %4292 = vmatpush3.bf16.msra.mxu0 %v4289_v41 }
 0xd90   :  { %v2757_v9 = vpop.xlane.xlu1 %2756 }
 0xd91   :  { %4397 = vrcp.f32 %v2757_v9  ;;  %v3830_v9 = vld [vmem:[%s5108_s8 + $0x28] sm:$0xff] }
 0xd94   :  { %v2923_v10 = vpop.xlane.xlu0 %2922  ;;  %v3093_v11 = vpop.xlane.xlu1 %3092 }
 0xd95   :  { %4399 = vrcp.f32 %v2923_v10 }
 0xd96   :  { %4401 = vrcp.f32 %v3093_v11  ;;  %v3831_v11 = vld [vmem:[%s5108_s8 + $0x30] sm:$0xff] }
 0xd98   :  { %v3263_v14 = vpop.xlane.xlu1 %3262  ;;  %v3097_v19 = vpop.permute.xlu0 %3096 }
 0xd99   :  { %4403 = vrcp.f32 %v3263_v14  ;;  %v3832_v14 = vld [vmem:[%s5108_s8 + $0x38] sm:$0xff] }
 0xd9b   :  { %v4398_v15 = vpop.eup %4397 }
 0xd9c   :  { %v2759_v16 = vmul.f32 %v4398_v15, %v4382_v51  ;;  %v3267_v21 = vpop.permute.xlu1 %3266  ;;  %v4297_v15 = vpack.c.bf16 %v3832_v14, %v3831_v11  ;;  %v3850_v11 = vld [vmem:[%s5114_s12 + $0x1] ss:$0 sm:$0xff] }
 0xd9e   :  { %4164 = vmatmul.mubr.msk.f32.vlgmr.msra.gmra.mrb[34].mxu1 %vm152_vm2, %v2759_v16  ;;  %v3837_v16 = vld [vmem:[%s5109_s10 + $0x40] sm:$0xff] }
 0xd9f   :  { %v4400_v17 = vpop.eup %4399  ;;  %4172 = vmatpush3.msra.mxu1 %v2927_v6  ;;  %4173 = vmatprep.mubr.msk.f32.mxu1 %vm4414_vm1, %v4413_v8 }
 0xda0   :  { %v2925_v12 = vmul.f32 %v4400_v17, %v4945_v52  ;;  %4181 = vmatprep.subr.mxu1 %v4413_v8  ;;  %v4402_v18 = vpop.eup %4401  ;;  %v3838_v17 = vld [vmem:[%s5109_s10 + $0x48] sm:$0xff] }
 0xda1   :  { %v3095_v20 = vmul.f32 %v4402_v18, %v4948_v54  ;;  %v4301_v18 = vpack.c.bf16 %v3838_v17, %v3837_v16  ;;  %v3852_v16 = vld [vmem:[%s5115_s13 + $0x1] ss:$0 sm:$0xff] }
 0xda2   :  { %4174 = vmatmul.mubr.msk.f32.vlgmr.msra.gmra.mrb[36].mxu1 %vm152_vm2, %v2925_v12  ;;  %v3839_v12 = vld [vmem:[%s5109_s10 + $0x50] sm:$0xff] }
 0xda3   :  { %4182 = vmatpush3.msra.mxu1 %v3097_v19  ;;  %4183 = vmatprep.mubr.msk.f32.mxu1 %vm4414_vm1, %v4413_v8  ;;  %v4404_v45 = vpop.eup %4403  ;;  %v3840_v19 = vld [vmem:[%s5109_s10 + $0x58] sm:$0xff] }
 0xda4   :  { %4191 = vmatprep.subr.mxu1 %v4413_v8  ;;  %v3265_v24 = vmul.f32 %v4404_v45, %v4954_v56  ;;  %v3822_v56 = vld [vmem:[%s5107_s5 + $0x1] ss:$0 sm:$0xff]  ;;  %4302 = vmatprep.subr.bf16.mxu0 %v4301_v18 }
 0xda5   :  { %v3841_v45 = vld [vmem:[%s5109_s10 + $0x60] sm:$0xff] }
 0xda6   :  { %4184 = vmatmul.mubr.msk.f32.vlgmr.msra.gmra.mrb[38].mxu1 %vm152_vm2, %v3095_v20  ;;  %v4305_v20 = vpack.c.bf16 %v3840_v19, %v3839_v12 }
 0xda7   :  { %4192 = vmatpush3.msra.mxu1 %v3267_v21  ;;  %4193 = vmatprep.mubr.msk.f32.mxu1 %vm4414_vm1, %v4413_v8  ;;  %v3842_v21 = vld [vmem:[%s5109_s10 + $0x68] sm:$0xff] }
 0xdaa   :  { %4194 = vmatmul.mubr.msk.f32.vlgmr.msra.gmra.mrb[40].mxu1 %vm152_vm2, %v3265_v24  ;;  %v4309_v24 = vpack.c.bf16 %v3842_v21, %v3841_v45 }
 0xe34   :  { %v2150_v25 = vpop.f32.mrb[26].mxu1 }
 0xe35   :  { %2154 = vst.msk [vmem:[#allocation2] sm:$0xff] %vm152_vm2, %v2150_v25  ;;  %v4125_v26 = vpop.f32.mrb[27].mxu1 }
 0xe38   :  { %v2316_v30 = vpop.f32.mrb[28].mxu1 }
 0xe39   :  { %2321 = vrot.lane.b32.xlu0 %v2316_v30, %s4426_s24  ;;  %v4135_v31 = vpop.f32.mrb[29].mxu1 }
 0xe3c   :  { %v2486_v32 = vpop.f32.mrb[30].mxu1 }
 0xe3d   :  { %2491 = vrot.lane.b32.xlu1 %v2486_v32, %s5133_s28  ;;  %v4145_v27 = vpop.f32.mrb[31].mxu1 }
 0xe40   :  { %v2656_v33 = vpop.f32.mrb[32].mxu1 }
 0xe41   :  { %2661 = vrot.lane.b32.xlu1 %v2656_v33, %s5134_s30  ;;  %v4155_v8 = vpop.f32.mrb[33].mxu1 }
 0xe42   :  { %v3826_v8 = vld [vmem:[%s5110_s6 + $0x1] ss:$0 sm:$0xff] }
 0xe71   :  { %v2832_v37 = vpop.f32.mrb[34].mxu1 }
 0xe72   :  { %2836 = vst.msk [vmem:[#allocation2 + $0x8] sm:$0xff] %vm152_vm2, %v2832_v37  ;;  %v4165_v40 = vpop.f32.mrb[35].mxu1 }
 0xe75   :  { %v2998_v42 = vpop.f32.mrb[36].mxu1 }
 0xe76   :  { %3003 = vrot.lane.b32.xlu0 %v2998_v42, %s4426_s24  ;;  %v4175_v43 = vpop.f32.mrb[37].mxu1  ;;  %v3843_v42 = vld [vmem:[%s5109_s10 + $0x70] sm:$0xff] }
 0xe77   :  { %v3844_v43 = vld [vmem:[%s5109_s10 + $0x78] sm:$0xff] }
 0xe79   :  { %v3168_v44 = vpop.f32.mrb[38].mxu1 }
 0xe7a   :  { %3173 = vrot.lane.b32.xlu0 %v3168_v44, %s5133_s28  ;;  %v4185_v46 = vpop.f32.mrb[39].mxu1  ;;  %v4313_v44 = vpack.c.bf16 %v3844_v43, %v3843_v42 }
 0xe7b   :  { %v3834_v46 = vld [vmem:[%s5112_s9 + $0x1] ss:$0 sm:$0xff] }
 0xe7d   :  { %v3338_v47 = vpop.f32.mrb[40].mxu1 }
 0xe7e   :  { %3343 = vrot.lane.b32.xlu1 %v3338_v47, %s5134_s30  ;;  %v4195_v48 = vpop.f32.mrb[41].mxu1 }
 0xeab   :  { %v2322_v49 = vpop.permute.xlu0 %2321 }
 0xeac   :  { %2324 = vst.msk [vmem:[#allocation2] sm:$0xff] %vm484_vm3, %v2322_v49 }
 0xeaf   :  { %v2492_v50 = vpop.permute.xlu1 %2491 }
 0xeb0   :  { %2494 = vst.msk [vmem:[#allocation2] sm:$0xff] %vm655_vm4, %v2492_v50 }
 0xeb3   :  { %v2662_v51 = vpop.permute.xlu1 %2661 }
 0xeb4   :  { %2664 = vst.msk [vmem:[#allocation2] sm:$0xff] %vm826_vm5, %v2662_v51 }
 0xebb   :  { %v3347_v52 = vld [vmem:[#allocation2] sm:$0xff] }
 0xebc   :  { %4204 = vmatprep.mubr.msk.f32.mxu0 %vm60_vm0, %v3347_v52 }
 0xee8   :  { %v3004_v53 = vpop.permute.xlu0 %3003 }
 0xee9   :  { %3006 = vst.msk [vmem:[#allocation2 + $0x8] sm:$0xff] %vm484_vm3, %v3004_v53  ;;  %v3846_v53 = vld [vmem:[%s5113_s11 + $0x1] ss:$0 sm:$0xff] }
 0xeec   :  { %v3174_v54 = vpop.permute.xlu0 %3173 }
 0xeed   :  { %3176 = vst.msk [vmem:[#allocation2 + $0x8] sm:$0xff] %vm655_vm4, %v3174_v54 }
 0xef0   :  { %v3344_v13 = vpop.permute.xlu1 %3343 }
 0xef1   :  { %3346 = vst.msk [vmem:[#allocation2 + $0x8] sm:$0xff] %vm826_vm5, %v3344_v13 }
 0xef8   :  { %v3348_v55 = vld [vmem:[#allocation2 + $0x8] sm:$0xff] }
 0xef9   :  { %4205 = vmatmul.mubr.msk.f32.vlgmr.msra.gmra.mrb[32].mxu0 %vm60_vm0, %v3348_v55 }
 0xefa   :  { %4304 = vmatpush3.bf16.msra.mxu0 %v4301_v18 }
 0xefb   :  { %4306 = vmatprep.subr.bf16.mxu0 %v4305_v20 }
 0xefe   :  { %4308 = vmatpush3.bf16.msra.mxu0 %v4305_v20 }
 0xeff   :  { %4310 = vmatprep.subr.bf16.mxu0 %v4309_v24 }
 0xf02   :  { %4312 = vmatpush3.bf16.msra.mxu0 %v4309_v24 }
 0xf03   :  { %4314 = vmatprep.subr.bf16.mxu0 %v4313_v44 }
 0xf06   :  { %4316 = vmatpush3.bf16.msra.mxu0 %v4313_v44 }
 0xfcc   :  { %v4206_v57 = vpop.f32.mrb[32].mxu0 }
 0xfcd   :  { %v3440_v58 = vadd.f32 %v4206_v57, %v3822_v56  ;;  %v3434_v59 = vpop.f32.mrb[33].mxu0 }
 0xfce   :  { %v3435_v60 = vadd.f32 %v3822_v56, %v3434_v59 }
 0xfcf   :  { %v3444_v61 = vadd.f32 %v3440_v58, %v4825_v23 }
 0xfd0   :  { %v3443_v62 = vadd.f32 %v3435_v60, %v4823_v22  ;;  %v3829_v22 = vld [vmem:[%s5108_s8 + $0x20] sm:$0xff] }
 0xfd1   :  { %v3448_v63 = vsel %vm60_vm0, %v3444_v61, 0.0  ;;  %v4293_v10 = vpack.c.bf16 %v3830_v9, %v3829_v22 }
 0xfd2   :  { %3449 = vadd.xlane.f32.xlu1 %v3448_v63  ;;  %v3445_v7 = vsel %vm60_vm0, %v3443_v62, 0.0 }
 0xfd3   :  { %3446 = vadd.xlane.f32.xlu0 %v3445_v7  ;;  %4294 = vmatprep.subr.bf16.mxu1 %v4293_v10 }
 0xfd4   :  { %4296 = vmatpush3.bf16.msra.mxu1 %v4293_v10 }
 0xfd5   :  { %4298 = vmatprep.subr.bf16.mxu1 %v4297_v15 }
 0xfd8   :  { %4300 = vmatpush3.bf16.msra.mxu1 %v4297_v15 }
0x105f   :  { %v3450_v5 = vpop.xlane.xlu1 %3449 }
0x1060   :  { %v3452_v0 = vmul.f32 0.03125, %v3450_v5  ;;  %v3447_v28 = vpop.xlane.xlu0 %3446 }
0x1061   :  { %v3451_v1 = vmul.f32 0.03125, %v3447_v28 }
0x1062   :  { %v3454_v2 = vsub.f32 %v3444_v61, %v3452_v0 }
0x1063   :  { %v3453_v3 = vsub.f32 %v3443_v62, %v3451_v1 }
0x1064   :  { %v3456_v6 = vmul.f32 %v3454_v2, %v3454_v2 }
0x1065   :  { %v3455_v29 = vmul.f32 %v3453_v3, %v3453_v3 }
0x1066   :  { %v3460_v23 = vsel %vm60_vm0, %v3456_v6, 0.0 }
0x1067   :  { %v3457_v4 = vsel %vm60_vm0, %v3455_v29, 0.0 }
0x1068   :  { %3458 = vadd.xlane.f32.xlu0 %v3457_v4 }
0x106c   :  { %3461 = vadd.xlane.f32.xlu0 %v3460_v23 }
0x10f5   :  { %v3459_v25 = vpop.xlane.xlu0 %3458 }
0x10f6   :  { %v3463_v26 = vmul.f32 0.03125, %v3459_v25 }
0x10f8   :  { %v3465_v30 = vadd.f32 1e-05, %v3463_v26 }
0x10f9   :  { %v3462_v31 = vpop.xlane.xlu0 %3461 }
0x10fa   :  { %4405 = vrsqrt.f32 %v3465_v30  ;;  %v3464_v32 = vmul.f32 0.03125, %v3462_v31 }
0x10fc   :  { %v3466_v27 = vadd.f32 1e-05, %v3464_v32 }
0x10fe   :  { %4407 = vrsqrt.f32 %v3466_v27 }
0x1104   :  { %v4406_v33 = vpop.eup %4405 }
0x1105   :  { %v3469_v34 = vmul.f32 %v4406_v33, %v3453_v3 }
0x1107   :  { %v3479_v36 = vmul.f32 %v3826_v8, %v3469_v34 }
0x1108   :  { %v4408_v37 = vpop.eup %4407 }
0x1109   :  { %v3470_v38 = vmul.f32 %v4408_v37, %v3454_v2  ;;  %v3489_v39 = vadd.f32 %v3828_v35, %v3479_v36 }
0x110b   :  { %v3480_v40 = vmul.f32 %v3826_v8, %v3470_v38  ;;  %4215 = vmatprep.mubr.msk.f32.mxu1 %vm60_vm0, %v3489_v39 }
0x110d   :  { %v3490_v41 = vadd.f32 %v3828_v35, %v3480_v40 }
0x110f   :  { %4216 = vmatmul.mubr.msk.f32.vlgmr.msra.gmra.mrb[42].mxu1 %vm60_vm0, %v3490_v41 }
0x11e2   :  { %v4217_v47 = vpop.f32.mrb[42].mxu1 }
0x11e3   :  { %v3582_v48 = vadd.f32 %v4217_v47, %v3834_v46  ;;  %v3576_v49 = vpop.f32.mrb[43].mxu1 }
0x11e4   :  { %v3577_v50 = vadd.f32 %v3834_v46, %v3576_v49 }
0x11e5   :  { %v3586_v52 = vmax.f32 %v3582_v48, 0.0 }
0x11e6   :  { %v3585_v51 = vmax.f32 %v3577_v50, 0.0 }
0x11e8   :  { %4234 = vmatprep.mubr.msk.f32.mxu0 %vm1761_vm6, %v3585_v51 }
0x11e9   :  { %4235 = vmatmul.mubr.msk.f32.vlgmr.msra.gmra.mrb[34].mxu0 %vm1761_vm6, %v3586_v52 }
0x12bc   :  { %v4236_v54 = vpop.f32.mrb[34].mxu0 }
0x12bd   :  { %v3682_v13 = vadd.f32 %v4236_v54, %v3846_v53  ;;  %v3676_v55 = vpop.f32.mrb[35].mxu0 }
0x12be   :  { %v3677_v56 = vadd.f32 %v3846_v53, %v3676_v55 }
0x12bf   :  { %v3686_v57 = vadd.f32 %v3682_v13, %v3490_v41 }
0x12c0   :  { %v3685_v58 = vadd.f32 %v3677_v56, %v3489_v39 }
0x12c1   :  { %v3690_v59 = vsel %vm60_vm0, %v3686_v57, 0.0 }
0x12c2   :  { %3691 = vadd.xlane.f32.xlu0 %v3690_v59  ;;  %v3687_v60 = vsel %vm60_vm0, %v3685_v58, 0.0 }
0x12c3   :  { %3688 = vadd.xlane.f32.xlu1 %v3687_v60 }
0x134f   :  { %v3692_v61 = vpop.xlane.xlu0 %3691 }
0x1350   :  { %v3694_v62 = vmul.f32 0.03125, %v3692_v61  ;;  %v3689_v63 = vpop.xlane.xlu1 %3688 }
0x1351   :  { %v3693_v7 = vmul.f32 0.03125, %v3689_v63 }
0x1352   :  { %v3696_v5 = vsub.f32 %v3686_v57, %v3694_v62 }
0x1353   :  { %v3695_v0 = vsub.f32 %v3685_v58, %v3693_v7 }
0x1354   :  { %v3698_v28 = vmul.f32 %v3696_v5, %v3696_v5 }
0x1355   :  { %v3697_v1 = vmul.f32 %v3695_v0, %v3695_v0 }
0x1356   :  { %v3702_v2 = vsel %vm60_vm0, %v3698_v28, 0.0 }
0x1357   :  { %3703 = vadd.xlane.f32.xlu0 %v3702_v2  ;;  %v3699_v3 = vsel %vm60_vm0, %v3697_v1, 0.0 }
0x1358   :  { %3700 = vadd.xlane.f32.xlu1 %v3699_v3 }
0x13e4   :  { %v3704_v29 = vpop.xlane.xlu0 %3703 }
0x13e5   :  { %v3706_v4 = vmul.f32 0.03125, %v3704_v29  ;;  %v3701_v6 = vpop.xlane.xlu1 %3700 }
0x13e6   :  { %v3705_v23 = vmul.f32 0.03125, %v3701_v6 }
0x13e7   :  { %v3708_v22 = vadd.f32 1e-05, %v3706_v4 }
0x13e8   :  { %v3707_v9 = vadd.f32 1e-05, %v3705_v23 }
0x13e9   :  { %4409 = vrsqrt.f32 %v3708_v22 }
0x13ea   :  { %4411 = vrsqrt.f32 %v3707_v9 }
0x13f3   :  { %v4410_v10 = vpop.eup %4409 }
0x13f4   :  { %v4412_v14 = vpop.eup %4411  ;;  %v3712_v15 = vmul.f32 %v4410_v10, %v3696_v5 }
0x13f5   :  { %v3711_v17 = vmul.f32 %v4412_v14, %v3695_v0 }
0x13f6   :  { %v3722_v12 = vmul.f32 %v3850_v11, %v3712_v15 }
0x13f7   :  { %v3721_v18 = vmul.f32 %v3850_v11, %v3711_v17 }
0x13f8   :  { %v3732_v19 = vadd.f32 %v3852_v16, %v3722_v12 }
0x13f9   :  { %v3731_v20 = vadd.f32 %v3852_v16, %v3721_v18 }
0x13fa   :  { %3734 = vst.msk [vmem:[%s5116_s14 + $0x8] sm:$0xff] %vm60_vm0, %v3732_v19 }
0x13fb   :  { %3733 = vst.msk [vmem:[%s5116_s14] sm:$0xff] %vm60_vm0, %v3731_v20 }

</bundles_post_ra>
